<compile_context>
chip_gen: v7x
topology: tpu7x:2x2x1
jax: 0.10.0
libtpu: 0.0.40
codegen_flags: <defaults>
</compile_context>

<pallas_src>
import jax
import jax.numpy as jnp
from jax.experimental import pallas as pl
from jax.experimental.pallas import tpu as pltpu

# Small, self-consistent shapes (enc_hid_dim == dec_hid_dim so the GRU input
# size emb_dim + dec_hid_dim matches cat([embedded, weighted])).
B, S = 2, 8            # batch, source length
V, E = 32, 16          # output_dim (vocab), emb_dim
HE, HD = 32, 32        # enc_hid_dim, dec_hid_dim
HDP = 128              # hidden dim padded to a full lane width
VP = 128               # vocab dim padded to a full lane width
HAP = 128              # attention hidden dim padded to a full lane width
T_DEC = 4              # decode steps for the multi-step (in-kernel loop) test


def _decoder_seq_kernel(emb_ref, hid0_ref, enc_ref, encp_ref,
                        w_hid_ref, w_emb_ref, w_ctx_ref, wo_h_ref, b_ref,
                        pred_ref, h_ref):
    t = pl.program_id(0)

    # t == 0: load the initial hidden state into the VMEM-resident output block
    # that carries h across all decode steps (accumulator pattern: constant
    # out-spec index over the "arbitrary" time axis).
    @pl.when(t == 0)
    def _():
        h_ref[...] = hid0_ref[...]

    h = h_ref[...]                           # [Bp, Hdp]   padded lanes are zero
    emb = emb_ref[0]                         # [Bp, E]     this step's embedded token
    enc = enc_ref[...]                       # [Bp, S, He]
    encp = encp_ref[...]                     # [Bp, S, Hap] = enc @ Wae + b_a (hoisted)

    hdp = h.shape[-1]
    g3 = 3 * hdp
    hap = encp.shape[-1]
    vp = pred_ref.shape[-1]

    # packed small-operand array: [b_ih | b_hh | b_out | v_attn], all 128-aligned
    bih = b_ref[:, 0:g3]                     # [1, 3*Hdp]
    bhh = b_ref[:, g3:2 * g3]                # [1, 3*Hdp]
    bo = b_ref[:, 2 * g3:2 * g3 + vp]        # [1, Vp]
    va = b_ref[:, 2 * g3 + vp:]              # [1, Hap]

    # ---- hid-side packed dot: [GRU hidden gates | attention hidden projection] ----
    hid_packed = jnp.dot(h, w_hid_ref[...], preferred_element_type=jnp.float32)   # [Bp, 3Hdp+Hap]
    gh = hid_packed[:, :g3] + bhh                                                  # [Bp, 3*Hdp]
    hid_proj = hid_packed[:, g3:]                                                  # [Bp, Hap]

    # ---- additive (Bahdanau) attention over S; scores via VPU mul + lane reduce ----
    energy = jnp.tanh(encp + hid_proj[:, None, :])                                 # [Bp, S, Hap]
    scores = jnp.sum(energy * va.reshape(1, 1, hap), axis=-1, keepdims=True)       # [Bp, S, 1]
    scores = scores - jnp.max(scores, axis=1, keepdims=True)
    p = jnp.exp(scores)
    attn = p / jnp.sum(p, axis=1, keepdims=True)     # exact softmax (review correctness note)
    ctx = jnp.sum(attn * enc, axis=1)                                              # [Bp, He]

    # ---- per-source packed dots: [GRU input gates | vocab-logit contribution] ----
    emb_packed = jnp.dot(emb, w_emb_ref[...], preferred_element_type=jnp.float32)  # [Bp, 3Hdp+Vp]
    ctx_packed = jnp.dot(ctx, w_ctx_ref[...], preferred_element_type=jnp.float32)  # [Bp, 3Hdp+Vp]
    gi = emb_packed[:, :g3] + ctx_packed[:, :g3] + bih                              # [Bp, 3*Hdp]

    # ---- single-step GRU (PyTorch gate order r, z, n) ----
    # Padded-lane invariant: zero weight rows/cols and zero bias lanes give
    # r = z = 0.5, n = 0 on padded lanes, so h_pad stays exactly 0.
    r = jax.nn.sigmoid(gi[:, 0 * hdp:1 * hdp] + gh[:, 0 * hdp:1 * hdp])
    z = jax.nn.sigmoid(gi[:, 1 * hdp:2 * hdp] + gh[:, 1 * hdp:2 * hdp])
    n = jnp.tanh(gi[:, 2 * hdp:3 * hdp] + r * gh[:, 2 * hdp:3 * hdp])
    h_new = (1.0 - z) * n + z * h                                                   # [Bp, Hdp]

    # ---- prediction: emb/ctx contributions already computed in the packed dots ----
    pred = (emb_packed[:, g3:] + ctx_packed[:, g3:] + bo
            + jnp.dot(h_new, wo_h_ref[...], preferred_element_type=jnp.float32))    # [Bp, Vp]

    pred_ref[0] = pred.astype(pred_ref.dtype)
    h_ref[...] = h_new.astype(h_ref.dtype)


def prepare_params(p, *, hdp=HDP, vp=VP, hap=HAP):
    """One-time host-side packing: all slicing / transposition / gate scattering /
    zero padding is hoisted here so the decode path does no weight math at all."""
    v, e = p["embedding"].shape
    hd = p["gru_w_hh"].shape[1]
    he = p["attn_w"].shape[1] - hd

    def pad_cols(x, n):
        return jnp.pad(x, ((0, 0), (0, n - x.shape[1])))

    def pad_rows(x, n):
        return jnp.pad(x, ((0, n - x.shape[0]), (0, 0)))

    def scatter_gates(w):  # [K, 3*hd] -> [K, 3*hdp], each gate block zero-padded to hdp lanes
        return jnp.concatenate(
            [pad_cols(w[:, g * hd:(g + 1) * hd], hdp) for g in range(3)], axis=1)

    # attention pieces
    wae = p["attn_w"][:, hd:].T                                   # [He, Ha]  encoder side (used in wrapper)
    ba = p["attn_b"][None, :]                                     # [1, Ha]   folded into encoder projection
    wah = pad_cols(pad_rows(p["attn_w"][:, :hd].T, hdp), hap)     # [Hdp, Hap] hidden side -> merged into w_hid
    va = pad_cols(p["attn_v"][None, :], hap)                      # [1, Hap]

    # per-source packed weights: each of emb / ctx / hid feeds ONE wide dot
    w_ih_t = p["gru_w_ih"].T                                      # [E+He, 3*Hd]
    w_out_t = p["out_w"].T                                        # [E+He+Hd, V]
    w_emb = jnp.concatenate([scatter_gates(w_ih_t[:e]),
                             pad_cols(w_out_t[:e], vp)], axis=1)                   # [E,   3Hdp+Vp]
    w_ctx = jnp.concatenate([scatter_gates(w_ih_t[e:]),
                             pad_cols(w_out_t[e:e + he], vp)], axis=1)             # [He,  3Hdp+Vp]
    w_hid = jnp.concatenate([scatter_gates(pad_rows(p["gru_w_hh"].T, hdp)),
                             wah], axis=1)                                          # [Hdp, 3Hdp+Hap]
    wo_h = pad_cols(pad_rows(w_out_t[e + he:], hdp), vp)                            # [Hdp, Vp]

    # single packed bias / score-vector operand (every slice boundary is 128-aligned)
    b_all = jnp.concatenate([scatter_gates(p["gru_b_ih"][None, :]),
                             scatter_gates(p["gru_b_hh"][None, :]),
                             pad_cols(p["out_b"][None, :], vp),
                             va], axis=1)                                           # [1, 6*Hdp+Vp+Hap]

    # TODO(synk): on v6e/v7x cast w_emb/w_ctx/w_hid/wo_h to bf16 (f32 accumulation via
    # preferred_element_type) to halve the weight VMEM footprint / DMA bytes.
    return dict(embedding=p["embedding"], wae=wae, ba=ba,
                w_emb=w_emb, w_ctx=w_ctx, w_hid=w_hid, wo_h=wo_h, b_all=b_all,
                dims=dict(e=e, he=he, hd=hd, hdp=hdp, hap=hap, v=v, vp=vp))


def decoder_decode_steps(tokens, hidden, encoder_outputs, packed):
    """Run T teacher-forced decode steps in ONE kernel call.

    tokens [T, B] int32, hidden [1, B, Hd], encoder_outputs [S, B, He] (time-major).
    Returns (predictions [T, B, V], hidden [1, B, Hd]); step t equals the PyTorch
    forward applied to (tokens[t], hidden_t, encoder_outputs)."""
    d = packed["dims"]
    t_steps, b = tokens.shape
    b_pad = pl.cdiv(b, 8) * 8       # pad batch to a full f32 sublane tile

    # ---- per-SEQUENCE glue (computed once per call, not per decode step) ----
    tok_p = jnp.pad(tokens, ((0, 0), (0, b_pad - b)))
    emb_seq = jnp.take(packed["embedding"], tok_p, axis=0)                    # [T, Bp, E]
    # TODO(synk): nn.Dropout(p) is the identity here (eval-mode forward); no RNG dropout in kernel.
    hid0 = jnp.pad(hidden[0], ((0, b_pad - b), (0, d["hdp"] - d["hd"])))      # [Bp, Hdp]
    enc = jnp.pad(jnp.transpose(encoder_outputs, (1, 0, 2)),
                  ((0, b_pad - b), (0, 0), (0, 0)))                           # [Bp, S, He]
    # decode-step-invariant encoder projection (b_a folded in), hoisted out of the kernel
    encp = jnp.einsum("bse,eh->bsh", enc, packed["wae"],
                      precision=jax.lax.Precision.HIGHEST) + packed["ba"]
    encp = jnp.pad(encp, ((0, 0), (0, 0), (0, d["hap"] - encp.shape[-1])))    # [Bp, S, Hap]

    def const_spec(x):  # whole array, same block every step -> DMA'd once, VMEM-resident
        n = x.ndim
        return pl.BlockSpec(x.shape, lambda t, _n=n: (0,) * _n)

    consts = (hid0, enc, encp, packed["w_hid"], packed["w_emb"],
              packed["w_ctx"], packed["wo_h"], packed["b_all"])

    pred_pad, h_pad = pl.pallas_call(
        _decoder_seq_kernel,
        out_shape=(jax.ShapeDtypeStruct((t_steps, b_pad, d["vp"]), jnp.float32),
                   jax.ShapeDtypeStruct((b_pad, d["hdp"]), jnp.float32)),
        grid_spec=pltpu.PrefetchScalarGridSpec(
            num_scalar_prefetch=0,
            grid=(t_steps,),
            in_specs=[pl.BlockSpec((1, b_pad, d["e"]), lambda t: (t, 0, 0))]
                     + [const_spec(x) for x in consts],
            out_specs=(pl.BlockSpec((1, b_pad, d["vp"]), lambda t: (t, 0, 0)),
                       pl.BlockSpec((b_pad, d["hdp"]), lambda t: (0, 0)))),
        compiler_params=pltpu.CompilerParams(
            dimension_semantics=("arbitrary",)),    # hidden state carried across steps
    )(emb_seq, *consts)

    # TODO(synk): at realistic vocab sizes, tile the vocab projection over an extra
    # "parallel" grid axis (uses v7x's 2nd TensorCore and respects its 64 MiB VMEM).
    predictions = pred_pad[:, :b, :d["v"]]                                    # [T, B, V]
    hidden_new = h_pad[:b, :d["hd"]][None]                                    # [1, B, Hd]
    return predictions, hidden_new


def decoder_with_attention(input_ids, hidden, encoder_outputs, packed):
    """Single-step forward matching the PyTorch module: input [B], hidden [1,B,Hd],
    encoder_outputs [S,B,He] -> (prediction [B,V], hidden [1,B,Hd])."""
    preds, h_new = decoder_decode_steps(input_ids[None, :], hidden, encoder_outputs, packed)
    return preds[0], h_new


def reference_forward(input_ids, hidden, encoder_outputs, p):
    """Pure-JAX mirror of the PyTorch forward (eval mode), for validation."""
    hp = jax.lax.Precision.HIGHEST
    emb = p["embedding"][input_ids]                          # [B, E]
    hid = hidden[0]                                          # [B, Hd]
    enc = jnp.transpose(encoder_outputs, (1, 0, 2))          # [B, S, He]
    s = enc.shape[1]
    hd = hid.shape[-1]
    hid_rep = jnp.broadcast_to(hid[:, None, :], (hid.shape[0], s, hd))
    cat = jnp.concatenate([hid_rep, enc], axis=-1)           # [B, S, Hd+He]
    energy = jnp.tanh(jnp.einsum("bsi,oi->bso", cat, p["attn_w"], precision=hp)
                      + p["attn_b"])
    scores = jnp.einsum("bsh,h->bs", energy, p["attn_v"], precision=hp)
    attn = jax.nn.softmax(scores, axis=1)[:, None, :]        # [B, 1, S]
    weighted = jnp.einsum("bos,bse->boe", attn, enc, precision=hp)[:, 0, :]  # bmm
    x = jnp.concatenate([emb, weighted], axis=-1)
    gi = jnp.einsum("bi,oi->bo", x, p["gru_w_ih"], precision=hp) + p["gru_b_ih"]
    gh = jnp.einsum("bi,oi->bo", hid, p["gru_w_hh"], precision=hp) + p["gru_b_hh"]
    r = jax.nn.sigmoid(gi[:, :hd] + gh[:, :hd])
    z = jax.nn.sigmoid(gi[:, hd:2 * hd] + gh[:, hd:2 * hd])
    n = jnp.tanh(gi[:, 2 * hd:] + r * gh[:, 2 * hd:])
    h_new = (1.0 - z) * n + z * hid
    cat_out = jnp.concatenate([emb, weighted, h_new], axis=-1)
    pred = jnp.einsum("bi,oi->bo", cat_out, p["out_w"], precision=hp) + p["out_b"]
    return pred, h_new[None]


if __name__ == "__main__":
    key = jax.random.PRNGKey(0)
    ks = jax.random.split(key, 14)
    sc = 0.1
    params = {
        "embedding": sc * jax.random.normal(ks[0], (V, E), jnp.float32),
        "attn_w":    sc * jax.random.normal(ks[1], (HD, HD + HE), jnp.float32),
        "attn_b":    sc * jax.random.normal(ks[2], (HD,), jnp.float32),
        "attn_v":    sc * jax.random.normal(ks[3], (HD,), jnp.float32),
        "gru_w_ih":  sc * jax.random.normal(ks[4], (3 * HD, E + HE), jnp.float32),
        "gru_w_hh":  sc * jax.random.normal(ks[5], (3 * HD, HD), jnp.float32),
        "gru_b_ih":  sc * jax.random.normal(ks[6], (3 * HD,), jnp.float32),
        "gru_b_hh":  sc * jax.random.normal(ks[7], (3 * HD,), jnp.float32),
        "out_w":     sc * jax.random.normal(ks[8], (V, E + HE + HD), jnp.float32),
        "out_b":     sc * jax.random.normal(ks[9], (V,), jnp.float32),
    }
    input_ids = jax.random.randint(ks[10], (B,), 0, V, dtype=jnp.int32)
    hidden = jax.random.normal(ks[11], (1, B, HD), jnp.float32)
    encoder_outputs = jax.random.normal(ks[12], (S, B, HE), jnp.float32)
    tokens_seq = jax.random.randint(ks[13], (T_DEC, B), 0, V, dtype=jnp.int32)

    packed = prepare_params(params)          # one-time weight packing (hoisted glue)
    packed = jax.block_until_ready(packed)

    # --- unit check of the padded-lane invariant the kernel relies on ---
    d = packed["dims"]
    g3 = 3 * d["hdp"]
    for wname in ("w_emb", "w_ctx", "w_hid"):
        w = packed[wname]
        for g in range(3):
            assert not bool(jnp.any(w[:, g * d["hdp"] + d["hd"]:(g + 1) * d["hdp"]])), \
                f"{wname}: padded gate lanes must be zero"
    assert not bool(jnp.any(packed["w_hid"][d["hd"]:, :])), "w_hid: padded hidden rows must be zero"
    assert not bool(jnp.any(packed["wo_h"][d["hd"]:, :])), "wo_h: padded hidden rows must be zero"
    for off in (0, g3):   # b_ih and b_hh gate-lane padding
        for g in range(3):
            assert not bool(jnp.any(
                packed["b_all"][:, off + g * d["hdp"] + d["hd"]:off + (g + 1) * d["hdp"]]))

    # --- single step: matches the PyTorch forward exactly ---
    pred, h_new = decoder_with_attention(input_ids, hidden, encoder_outputs, packed)
    (pred, h_new) = jax.block_until_ready((pred, h_new))
    ref_pred, ref_h = reference_forward(input_ids, hidden, encoder_outputs, params)
    assert pred.shape == (B, V) and h_new.shape == (1, B, HD)
    assert jnp.allclose(pred, ref_pred, atol=2e-3, rtol=2e-3)
    assert jnp.allclose(h_new, ref_h, atol=2e-3, rtol=2e-3)

    # --- multi-step decode: the in-kernel time loop keeps weights VMEM-resident ---
    preds_seq, h_seq = decoder_decode_steps(tokens_seq, hidden, encoder_outputs, packed)
    (preds_seq, h_seq) = jax.block_until_ready((preds_seq, h_seq))
    ref_h_t = hidden
    ref_list = []
    for t in range(T_DEC):
        rp, ref_h_t = reference_forward(tokens_seq[t], ref_h_t, encoder_outputs, params)
        ref_list.append(rp)
    ref_seq = jnp.stack(ref_list)
    assert preds_seq.shape == (T_DEC, B, V) and h_seq.shape == (1, B, HD)
    assert jnp.allclose(preds_seq, ref_seq, atol=5e-3, rtol=5e-3)
    assert jnp.allclose(h_seq, ref_h_t, atol=5e-3, rtol=5e-3)

    print("KERNEL_OK")
</pallas_src>

<mosaic_0001>
module attributes {stable_mosaic.version = 11 : i64} {
  func.func @_decoder_seq_kernel(%arg0: i32, %arg1: memref<1x8x16xf32, #tpu.memory_space<vmem>>, %arg2: memref<8x128xf32, #tpu.memory_space<vmem>>, %arg3: memref<8x8x32xf32, #tpu.memory_space<vmem>>, %arg4: memref<8x8x128xf32, #tpu.memory_space<vmem>>, %arg5: memref<128x512xf32, #tpu.memory_space<vmem>>, %arg6: memref<16x512xf32, #tpu.memory_space<vmem>>, %arg7: memref<32x512xf32, #tpu.memory_space<vmem>>, %arg8: memref<128x128xf32, #tpu.memory_space<vmem>>, %arg9: memref<1x1024xf32, #tpu.memory_space<vmem>>, %arg10: memref<1x8x128xf32, #tpu.memory_space<vmem>>, %arg11: memref<8x128xf32, #tpu.memory_space<vmem>>) attributes {dimension_semantics = [#tpu.dimension_semantics<arbitrary>], iteration_bounds = array<i64: 1>, scalar_prefetch = 0 : i64, scratch_operands = 0 : i64, tpu.core_type = #tpu.core_type<tc>, window_params = [{transform_indices = @transform_0, window_bounds = array<i64: 1, 8, 16>}, {pipeline_mode = #tpu.pipeline_mode<synchronous>, transform_indices = @transform_1, window_bounds = array<i64: 8, 128>}, {pipeline_mode = #tpu.pipeline_mode<synchronous>, transform_indices = @transform_2, window_bounds = array<i64: 8, 8, 32>}, {pipeline_mode = #tpu.pipeline_mode<synchronous>, transform_indices = @transform_3, window_bounds = array<i64: 8, 8, 128>}, {pipeline_mode = #tpu.pipeline_mode<synchronous>, transform_indices = @transform_4, window_bounds = array<i64: 128, 512>}, {pipeline_mode = #tpu.pipeline_mode<synchronous>, transform_indices = @transform_5, window_bounds = array<i64: 16, 512>}, {pipeline_mode = #tpu.pipeline_mode<synchronous>, transform_indices = @transform_6, window_bounds = array<i64: 32, 512>}, {pipeline_mode = #tpu.pipeline_mode<synchronous>, transform_indices = @transform_7, window_bounds = array<i64: 128, 128>}, {pipeline_mode = #tpu.pipeline_mode<synchronous>, transform_indices = @transform_8, window_bounds = array<i64: 1, 1024>}, {transform_indices = @transform_9, window_bounds = array<i64: 1, 8, 128>}, {pipeline_mode = #tpu.pipeline_mode<synchronous>, transform_indices = @transform_10, window_bounds = array<i64: 8, 128>}]} {
    %c0_i32 = arith.constant 0 : i32
    %0 = arith.cmpi eq, %arg0, %c0_i32 : i32
    %1 = arith.extui %0 : i1 to i32
    %c0_i32_0 = arith.constant 0 : i32
    %2 = arith.cmpi ne, %1, %c0_i32_0 : i32
    scf.if %2 {
      %c0_39 = arith.constant 0 : index
      %c0_40 = arith.constant 0 : index
      %86 = vector.load %arg2[%c0_39, %c0_40] : memref<8x128xf32, #tpu.memory_space<vmem>>, vector<8x128xf32>
      %c0_41 = arith.constant 0 : index
      %c0_42 = arith.constant 0 : index
      %87 = vector.load %arg11[%c0_41, %c0_42] : memref<8x128xf32, #tpu.memory_space<vmem>>, vector<8x128xf32>
      tpu.vector_store %arg11[%c0_41, %c0_42], %86 {strides = array<i32>} : memref<8x128xf32, #tpu.memory_space<vmem>>, vector<8x128xf32>,
    } else {
    }
    %c0 = arith.constant 0 : index
    %c0_1 = arith.constant 0 : index
    %3 = vector.load %arg11[%c0, %c0_1] : memref<8x128xf32, #tpu.memory_space<vmem>>, vector<8x128xf32>
    %c0_2 = arith.constant 0 : index
    %c0_3 = arith.constant 0 : index
    %c0_4 = arith.constant 0 : index
    %4 = vector.load %arg1[%c0_2, %c0_3, %c0_4] : memref<1x8x16xf32, #tpu.memory_space<vmem>>, vector<1x8x16xf32>
    %5 = vector.shape_cast %4 : vector<1x8x16xf32> to vector<8x16xf32>
    %c0_5 = arith.constant 0 : index
    %c0_6 = arith.constant 0 : index
    %c0_7 = arith.constant 0 : index
    %6 = vector.load %arg3[%c0_5, %c0_6, %c0_7] : memref<8x8x32xf32, #tpu.memory_space<vmem>>, vector<8x8x32xf32>
    %c0_8 = arith.constant 0 : index
    %c0_9 = arith.constant 0 : index
    %c0_10 = arith.constant 0 : index
    %7 = vector.load %arg4[%c0_8, %c0_9, %c0_10] : memref<8x8x128xf32, #tpu.memory_space<vmem>>, vector<8x8x128xf32>
    %c0_11 = arith.constant 0 : index
    %c0_12 = arith.constant 0 : index
    %8 = vector.load %arg9[%c0_11, %c0_12] : memref<1x1024xf32, #tpu.memory_space<vmem>>, vector<1x384xf32>
    %c0_13 = arith.constant 0 : index
    %c384 = arith.constant 384 : index
    %9 = vector.load %arg9[%c0_13, %c384] : memref<1x1024xf32, #tpu.memory_space<vmem>>, vector<1x384xf32>
    %c0_14 = arith.constant 0 : index
    %c768 = arith.constant 768 : index
    %10 = vector.load %arg9[%c0_14, %c768] : memref<1x1024xf32, #tpu.memory_space<vmem>>, vector<1x128xf32>
    %c0_15 = arith.constant 0 : index
    %c896 = arith.constant 896 : index
    %11 = vector.load %arg9[%c0_15, %c896] : memref<1x1024xf32, #tpu.memory_space<vmem>>, vector<1x128xf32>
    %c0_16 = arith.constant 0 : index
    %c0_17 = arith.constant 0 : index
    %12 = vector.load %arg5[%c0_16, %c0_17] : memref<128x512xf32, #tpu.memory_space<vmem>>, vector<128x512xf32>
    %cst = arith.constant dense<0.000000e+00> : vector<8x512xf32>
    %13 = tpu.matmul %3, %12, %cst {dimension_numbers = #tpu.dot_dimension_numbers<[1], [0], [0], [1], [0, 0, 1, 1], [], []>} : vector<8x128xf32>, vector<128x512xf32>, vector<8x512xf32> -> vector<8x512xf32>
    %14 = vector.extract_strided_slice %13 {offsets = [0, 0], sizes = [8, 384], strides = [1, 1]} : vector<8x512xf32> to vector<8x384xf32>
    %15 = vector.broadcast %9 : vector<1x384xf32> to vector<8x384xf32>
    %16 = arith.addf %14, %15 : vector<8x384xf32>
    %17 = vector.extract_strided_slice %13 {offsets = [0, 384], sizes = [8, 128], strides = [1, 1]} : vector<8x512xf32> to vector<8x128xf32>
    %18 = vector.shape_cast %17 : vector<8x128xf32> to vector<8x1x128xf32>
    %19 = vector.broadcast %18 : vector<8x1x128xf32> to vector<8x8x128xf32>
    %20 = arith.addf %7, %19 : vector<8x8x128xf32>
    %21 = math.tanh %20 : vector<8x8x128xf32>
    %22 = vector.shape_cast %11 : vector<1x128xf32> to vector<1x1x128xf32>
    %23 = vector.broadcast %22 : vector<1x1x128xf32> to vector<8x8x128xf32>
    %24 = arith.mulf %21, %23 : vector<8x8x128xf32>
    %cst_18 = arith.constant dense<0.000000e+00> : vector<8x8xf32>
    %25 = vector.multi_reduction <add>, %24, %cst_18 [2] : vector<8x8x128xf32> to vector<8x8xf32>
    %26 = vector.shape_cast %25 : vector<8x8xf32> to vector<8x8x1xf32>
    %cst_19 = arith.constant dense<0xFF800000> : vector<8x1xf32>
    %27 = vector.multi_reduction <maximumf>, %26, %cst_19 [1] : vector<8x8x1xf32> to vector<8x1xf32>
    %28 = vector.shape_cast %27 : vector<8x1xf32> to vector<8x1x1xf32>
    %29 = vector.broadcast %28 : vector<8x1x1xf32> to vector<8x8x1xf32>
    %30 = arith.subf %26, %29 : vector<8x8x1xf32>
    %31 = math.exp %30 : vector<8x8x1xf32>
    %cst_20 = arith.constant dense<0.000000e+00> : vector<8x1xf32>
    %32 = vector.multi_reduction <add>, %31, %cst_20 [1] : vector<8x8x1xf32> to vector<8x1xf32>
    %33 = vector.shape_cast %32 : vector<8x1xf32> to vector<8x1x1xf32>
    %34 = vector.broadcast %33 : vector<8x1x1xf32> to vector<8x8x1xf32>
    %35 = arith.divf %31, %34 : vector<8x8x1xf32>
    %36 = vector.broadcast %35 : vector<8x8x1xf32> to vector<8x8x32xf32>
    %37 = arith.mulf %36, %6 : vector<8x8x32xf32>
    %cst_21 = arith.constant dense<0.000000e+00> : vector<8x32xf32>
    %38 = vector.multi_reduction <add>, %37, %cst_21 [1] : vector<8x8x32xf32> to vector<8x32xf32>
    %c0_22 = arith.constant 0 : index
    %c0_23 = arith.constant 0 : index
    %39 = vector.load %arg6[%c0_22, %c0_23] : memref<16x512xf32, #tpu.memory_space<vmem>>, vector<16x512xf32>
    %cst_24 = arith.constant dense<0.000000e+00> : vector<8x512xf32>
    %40 = tpu.matmul %5, %39, %cst_24 {dimension_numbers = #tpu.dot_dimension_numbers<[1], [0], [0], [1], [0, 0, 1, 1], [], []>} : vector<8x16xf32>, vector<16x512xf32>, vector<8x512xf32> -> vector<8x512xf32>
    %c0_25 = arith.constant 0 : index
    %c0_26 = arith.constant 0 : index
    %41 = vector.load %arg7[%c0_25, %c0_26] : memref<32x512xf32, #tpu.memory_space<vmem>>, vector<32x512xf32>
    %cst_27 = arith.constant dense<0.000000e+00> : vector<8x512xf32>
    %42 = tpu.matmul %38, %41, %cst_27 {dimension_numbers = #tpu.dot_dimension_numbers<[1], [0], [0], [1], [0, 0, 1, 1], [], []>} : vector<8x32xf32>, vector<32x512xf32>, vector<8x512xf32> -> vector<8x512xf32>
    %43 = vector.extract_strided_slice %40 {offsets = [0, 0], sizes = [8, 384], strides = [1, 1]} : vector<8x512xf32> to vector<8x384xf32>
    %44 = vector.extract_strided_slice %42 {offsets = [0, 0], sizes = [8, 384], strides = [1, 1]} : vector<8x512xf32> to vector<8x384xf32>
    %45 = arith.addf %43, %44 : vector<8x384xf32>
    %46 = vector.broadcast %8 : vector<1x384xf32> to vector<8x384xf32>
    %47 = arith.addf %45, %46 : vector<8x384xf32>
    %48 = vector.extract_strided_slice %47 {offsets = [0, 0], sizes = [8, 128], strides = [1, 1]} : vector<8x384xf32> to vector<8x128xf32>
    %49 = vector.extract_strided_slice %16 {offsets = [0, 0], sizes = [8, 128], strides = [1, 1]} : vector<8x384xf32> to vector<8x128xf32>
    %50 = arith.addf %48, %49 : vector<8x128xf32>
    %51 = arith.negf %50 : vector<8x128xf32>
    %52 = math.exp %51 : vector<8x128xf32>
    %cst_28 = arith.constant 1.000000e+00 : f32
    %53 = vector.broadcast %cst_28 : f32 to vector<8x128xf32>
    %54 = arith.addf %53, %52 : vector<8x128xf32>
    %55 = arith.divf %53, %54 : vector<8x128xf32>
    %56 = vector.extract_strided_slice %47 {offsets = [0, 128], sizes = [8, 128], strides = [1, 1]} : vector<8x384xf32> to vector<8x128xf32>
    %57 = vector.extract_strided_slice %16 {offsets = [0, 128], sizes = [8, 128], strides = [1, 1]} : vector<8x384xf32> to vector<8x128xf32>
    %58 = arith.addf %56, %57 : vector<8x128xf32>
    %59 = arith.negf %58 : vector<8x128xf32>
    %60 = math.exp %59 : vector<8x128xf32>
    %cst_29 = arith.constant 1.000000e+00 : f32
    %61 = vector.broadcast %cst_29 : f32 to vector<8x128xf32>
    %62 = arith.addf %61, %60 : vector<8x128xf32>
    %63 = arith.divf %61, %62 : vector<8x128xf32>
    %64 = vector.extract_strided_slice %47 {offsets = [0, 256], sizes = [8, 128], strides = [1, 1]} : vector<8x384xf32> to vector<8x128xf32>
    %65 = vector.extract_strided_slice %16 {offsets = [0, 256], sizes = [8, 128], strides = [1, 1]} : vector<8x384xf32> to vector<8x128xf32>
    %66 = arith.mulf %55, %65 : vector<8x128xf32>
    %67 = arith.addf %64, %66 : vector<8x128xf32>
    %68 = math.tanh %67 : vector<8x128xf32>
    %cst_30 = arith.constant 1.000000e+00 : f32
    %69 = vector.broadcast %cst_30 : f32 to vector<8x128xf32>
    %70 = arith.subf %69, %63 : vector<8x128xf32>
    %71 = arith.mulf %70, %68 : vector<8x128xf32>
    %72 = arith.mulf %63, %3 : vector<8x128xf32>
    %73 = arith.addf %71, %72 : vector<8x128xf32>
    %74 = vector.extract_strided_slice %40 {offsets = [0, 384], sizes = [8, 128], strides = [1, 1]} : vector<8x512xf32> to vector<8x128xf32>
    %75 = vector.extract_strided_slice %42 {offsets = [0, 384], sizes = [8, 128], strides = [1, 1]} : vector<8x512xf32> to vector<8x128xf32>
    %76 = arith.addf %74, %75 : vector<8x128xf32>
    %77 = vector.broadcast %10 : vector<1x128xf32> to vector<8x128xf32>
    %78 = arith.addf %76, %77 : vector<8x128xf32>
    %c0_31 = arith.constant 0 : index
    %c0_32 = arith.constant 0 : index
    %79 = vector.load %arg8[%c0_31, %c0_32] : memref<128x128xf32, #tpu.memory_space<vmem>>, vector<128x128xf32>
    %cst_33 = arith.constant dense<0.000000e+00> : vector<8x128xf32>
    %80 = tpu.matmul %73, %79, %cst_33 {dimension_numbers = #tpu.dot_dimension_numbers<[1], [0], [0], [1], [0, 0, 1, 1], [], []>} : vector<8x128xf32>, vector<128x128xf32>, vector<8x128xf32> -> vector<8x128xf32>
    %81 = arith.addf %78, %80 : vector<8x128xf32>
    %c0_34 = arith.constant 0 : index
    %c0_35 = arith.constant 0 : index
    %c0_36 = arith.constant 0 : index
    %82 = vector.load %arg10[%c0_34, %c0_35, %c0_36] : memref<1x8x128xf32, #tpu.memory_space<vmem>>, vector<1x8x128xf32>
    %83 = vector.shape_cast %82 : vector<1x8x128xf32> to vector<8x128xf32>
    %84 = vector.shape_cast %81 : vector<8x128xf32> to vector<1x8x128xf32>
    tpu.vector_store %arg10[%c0_34, %c0_35, %c0_36], %84 {strides = array<i32>} : memref<1x8x128xf32, #tpu.memory_space<vmem>>, vector<1x8x128xf32>,
    %c0_37 = arith.constant 0 : index
    %c0_38 = arith.constant 0 : index
    %85 = vector.load %arg11[%c0_37, %c0_38] : memref<8x128xf32, #tpu.memory_space<vmem>>, vector<8x128xf32>
    tpu.vector_store %arg11[%c0_37, %c0_38], %73 {strides = array<i32>} : memref<8x128xf32, #tpu.memory_space<vmem>>, vector<8x128xf32>,
    return
  }
  func.func @transform_0(%arg0: i32) -> (i32, i32, i32) {
    %c0_i32 = arith.constant 0 : i32
    %c0_i32_0 = arith.constant 0 : i32
    %c0_i32_1 = arith.constant 0 : i32
    return %arg0, %c0_i32, %c0_i32_0 : i32, i32, i32
  }
  func.func @transform_1(%arg0: i32) -> (i32, i32) {
    %c0_i32 = arith.constant 0 : i32
    %c0_i32_0 = arith.constant 0 : i32
    %c0_i32_1 = arith.constant 0 : i32
    return %c0_i32, %c0_i32_0 : i32, i32
  }
  func.func @transform_2(%arg0: i32) -> (i32, i32, i32) {
    %c0_i32 = arith.constant 0 : i32
    %c0_i32_0 = arith.constant 0 : i32
    %c0_i32_1 = arith.constant 0 : i32
    %c0_i32_2 = arith.constant 0 : i32
    return %c0_i32, %c0_i32_0, %c0_i32_1 : i32, i32, i32
  }
  func.func @transform_3(%arg0: i32) -> (i32, i32, i32) {
    %c0_i32 = arith.constant 0 : i32
    %c0_i32_0 = arith.constant 0 : i32
    %c0_i32_1 = arith.constant 0 : i32
    %c0_i32_2 = arith.constant 0 : i32
    return %c0_i32, %c0_i32_0, %c0_i32_1 : i32, i32, i32
  }
  func.func @transform_4(%arg0: i32) -> (i32, i32) {
    %c0_i32 = arith.constant 0 : i32
    %c0_i32_0 = arith.constant 0 : i32
    %c0_i32_1 = arith.constant 0 : i32
    return %c0_i32, %c0_i32_0 : i32, i32
  }
  func.func @transform_5(%arg0: i32) -> (i32, i32) {
    %c0_i32 = arith.constant 0 : i32
    %c0_i32_0 = arith.constant 0 : i32
    %c0_i32_1 = arith.constant 0 : i32
    return %c0_i32, %c0_i32_0 : i32, i32
  }
  func.func @transform_6(%arg0: i32) -> (i32, i32) {
    %c0_i32 = arith.constant 0 : i32
    %c0_i32_0 = arith.constant 0 : i32
    %c0_i32_1 = arith.constant 0 : i32
    return %c0_i32, %c0_i32_0 : i32, i32
  }
  func.func @transform_7(%arg0: i32) -> (i32, i32) {
    %c0_i32 = arith.constant 0 : i32
    %c0_i32_0 = arith.constant 0 : i32
    %c0_i32_1 = arith.constant 0 : i32
    return %c0_i32, %c0_i32_0 : i32, i32
  }
  func.func @transform_8(%arg0: i32) -> (i32, i32) {
    %c0_i32 = arith.constant 0 : i32
    %c0_i32_0 = arith.constant 0 : i32
    %c0_i32_1 = arith.constant 0 : i32
    return %c0_i32, %c0_i32_0 : i32, i32
  }
  func.func @transform_9(%arg0: i32) -> (i32, i32, i32) {
    %c0_i32 = arith.constant 0 : i32
    %c0_i32_0 = arith.constant 0 : i32
    %c0_i32_1 = arith.constant 0 : i32
    return %arg0, %c0_i32, %c0_i32_0 : i32, i32, i32
  }
  func.func @transform_10(%arg0: i32) -> (i32, i32) {
    %c0_i32 = arith.constant 0 : i32
    %c0_i32_0 = arith.constant 0 : i32
    %c0_i32_1 = arith.constant 0 : i32
    return %c0_i32, %c0_i32_0 : i32, i32
  }
}

</mosaic_0001>

<bundles_post_ra>
// kernel: tpu_custom_call.1
= control target key start
LH: loop header
LB: loop body
LE: loop exit
PB: predicated region body
PF: predicated region fallthrough
CT: control target
= control target key end

     0   :  { %16 = vsyncpa [#allocation3], 0  ;;  %s2056_s0 = inlined_call_operand.hbm [shape: f32[1,8,16], index: 0, kind: input, shape index: {}]   ;;  %s2057_s1 = inlined_call_operand.hbm [shape: f32[8,128], index: 1, kind: input, shape index: {}]   ;;  %s2058_s2 = inlined_call_operand.hbm [shape: f32[8,8,32], index: 2, kind: input, shape index: {}]   ;;  %s2059_s3 = inlined_call_operand.hbm [shape: f32[8,8,128], index: 3, kind: input, shape index: {}]   ;;  %s2060_s4 = inlined_call_operand.hbm [shape: f32[128,512], index: 4, kind: input, shape index: {}]   ;;  %s2061_s5 = inlined_call_operand.hbm [shape: f32[16,512], index: 5, kind: input, shape index: {}]   ;;  %s2062_s6 = inlined_call_operand.hbm [shape: f32[32,512], index: 6, kind: input, shape index: {}]   ;;  %s2063_s7 = inlined_call_operand.hbm [shape: f32[128,128], index: 7, kind: input, shape index: {}]   ;;  %s2064_s8 = inlined_call_operand.vmem [shape: f32[1,1024], index: 8, kind: input, shape index: {}]   ;;  %s2065_s9 = inlined_call_operand.hbm [shape: f32[1,8,128], index: 9, kind: output, shape index: {0}]   ;;  %s2066_s10 = inlined_call_operand.hbm [shape: f32[8,128], index: 10, kind: output, shape index: {1}]  }
   0x1   :  { %17 = vsyncpa [#allocation6], 0 }
   0x2   :  { %18 = vsyncpa [#allocation9], 0 }
   0x3   :  { %19 = vsyncpa [#allocation12], 0 }
   0x4   :  { %20 = vsyncpa [#allocation15], 0 }
   0x5   :  { %21 = vsyncpa [#allocation4], 0 }
   0x6   :  { %22 = vsyncpa [#allocation18], 0  ;;  %s1733_s13 = smov [#allocation5]   ;;  %s1499_s17 = scalar_lea.hbm %s2057_s1, 128 }
   0x7   :  { %s39_s14 = sshll.u32 %s1733_s13, 4  ;;  %p1500_p0 = scmp.ne.s32.totalorder %s2057_s1, %s1499_s17  ;;  %s40_s14 = int_to_ptr.vmem [resolvable:$true] %s39_s14 }
   0x8   :  { %p1503_p1 = scmp.lt.u32.totalorder %s1499_s17, %s2057_s1 }
   0xa   :  { %p1505_p2 = pnand %p1503_p1, %p1500_p0 }
   0xc   :  { %1508 = shalt.err (!%p1505_p2)
}
   0xd   :  { %s1509_s22 = scalar_lea.vmem %s40_s14, 128  ;;  %p1514_p4 = scmp.lt.s32.totalorder %s40_s14, %s40_s14 }
   0xe   :  { %p1510_p3 = scmp.ne.s32.totalorder %s40_s14, %s1509_s22  ;;  %p1515_p5 = scmp.lt.s32.totalorder %s1509_s22, %s1509_s22 }
  0x10   :  { %p1516_p6 = por %p1515_p5, %p1514_p4 }
  0x12   :  { %p1517_p7 = pnand %p1516_p6, %p1510_p3 }
  0x14   :  { %1520 = shalt.err (!%p1517_p7)
}
  0x15   :  { %42 = dma.hbm_to_vmem [thread:$0]  %s2057_s1, 128, %s40_s14, [#allocation6]  }
  0x16   :  { %s1734_s25 = smov [#allocation8]   ;;  %s1521_s29 = scalar_lea.hbm %s2059_s3, 1024 }
  0x17   :  { %s60_s26 = sshll.u32 %s1734_s25, 4  ;;  %p1522_p8 = scmp.ne.s32.totalorder %s2059_s3, %s1521_s29  ;;  %s61_s26 = int_to_ptr.vmem [resolvable:$true] %s60_s26 }
  0x18   :  { %p1525_p9 = scmp.lt.u32.totalorder %s1521_s29, %s2059_s3 }
  0x1a   :  { %p1527_p10 = pnand %p1525_p9, %p1522_p8 }
  0x1c   :  { %1530 = shalt.err (!%p1527_p10)
}
  0x1d   :  { %s1531_s15 = scalar_lea.vmem %s61_s26, 1024  ;;  %p1536_p12 = scmp.lt.s32.totalorder %s61_s26, %s61_s26 }
  0x1e   :  { %p1532_p11 = scmp.ne.s32.totalorder %s61_s26, %s1531_s15  ;;  %p1537_p13 = scmp.lt.s32.totalorder %s1531_s15, %s1531_s15 }
  0x20   :  { %p1538_p0 = por %p1537_p13, %p1536_p12 }
  0x22   :  { %p1539_p1 = pnand %p1538_p0, %p1532_p11 }
  0x24   :  { %1542 = shalt.err (!%p1539_p1)
}
  0x25   :  { %s1735_s1 = smov 128   ;;  %s1736_s14 = smov 8  }
  0x26   :  { %66 = dma.hbm_to_vmem [thread:$0]  %s2059_s3, 1024, %s61_s26, [#allocation9], %s1735_s1, %s1735_s1, %s1736_s14  }
  0x27   :  { %s1737_s18 = smov [#allocation11]   ;;  %s1738_s20 = smov [#allocation2]  }
  0x28   :  { %s84_s19 = sshll.u32 %s1737_s18, 4  ;;  %s29_s21 = sshll.u32 %s1738_s20, 4  ;;  %s85_s19 = int_to_ptr.vmem [resolvable:$true] %s84_s19  ;;  %s30_s21 = int_to_ptr.vmem [resolvable:$true] %s29_s21 }
  0x29   :  { %s1543_s24 = scalar_lea.hbm %s2061_s5, 1024 }
  0x2a   :  { %p1544_p2 = scmp.ne.s32.totalorder %s2061_s5, %s1543_s24  ;;  %p1547_p3 = scmp.lt.u32.totalorder %s1543_s24, %s2061_s5 }
  0x2c   :  { %p1549_p4 = pnand %p1547_p3, %p1544_p2 }
  0x2e   :  { %1552 = shalt.err (!%p1549_p4)
}
  0x2f   :  { %s1553_s3 = scalar_lea.vmem %s85_s19, 1024  ;;  %p1558_p6 = scmp.lt.s32.totalorder %s85_s19, %s85_s19 }
  0x30   :  { %p1554_p5 = scmp.ne.s32.totalorder %s85_s19, %s1553_s3  ;;  %p1559_p7 = scmp.lt.s32.totalorder %s1553_s3, %s1553_s3 }
  0x32   :  { %p1560_p8 = por %p1559_p7, %p1558_p6 }
  0x34   :  { %p1561_p9 = pnand %p1560_p8, %p1554_p5 }
  0x36   :  { %1564 = shalt.err (!%p1561_p9)
}
  0x37   :  { %s1739_s26 = smov 512   ;;  %s1740_s30 = smov 32  }
  0x38   :  { %90 = dma.hbm_to_vmem [thread:$0]  %s2061_s5, 1024, %s85_s19, [#allocation12], %s1739_s26, %s1739_s26, %s1740_s30  }
  0x39   :  { %s1565_s16 = scalar_lea.hbm %s2056_s0, 128 }
  0x3a   :  { %p1566_p10 = scmp.ne.s32.totalorder %s2056_s0, %s1565_s16  ;;  %p1569_p11 = scmp.lt.u32.totalorder %s1565_s16, %s2056_s0 }
  0x3c   :  { %p1571_p12 = pnand %p1569_p11, %p1566_p10 }
  0x3e   :  { %1574 = shalt.err (!%p1571_p12)
}
  0x3f   :  { %s1575_s23 = scalar_lea.vmem %s30_s21, 128  ;;  %p1580_p0 = scmp.lt.s32.totalorder %s30_s21, %s30_s21 }
  0x40   :  { %p1576_p13 = scmp.ne.s32.totalorder %s30_s21, %s1575_s23  ;;  %p1581_p1 = scmp.lt.s32.totalorder %s1575_s23, %s1575_s23 }
  0x42   :  { %p1582_p2 = por %p1581_p1, %p1580_p0 }
  0x44   :  { %p1583_p3 = pnand %p1582_p2, %p1576_p13 }
  0x46   :  { %1586 = shalt.err (!%p1583_p3)
}
  0x47   :  { %32 = dma.hbm_to_vmem [thread:$0]  %s2056_s0, 128, %s30_s21, [#allocation3]  }
  0x48   :  { %s1741_s24 = smov [#allocation7]   ;;  %s1742_s27 = smov [#allocation10]  }
  0x49   :  { %s48_s25 = sshll.u32 %s1741_s24, 4  ;;  %s72_s28 = sshll.u32 %s1742_s27, 4  ;;  %s49_s25 = int_to_ptr.vmem [resolvable:$true] %s48_s25  ;;  %s1860_s28 = int_to_ptr.vmem [resolvable:$true] %s72_s28 }
  0x4a   :  { %s1587_s11 = scalar_lea.hbm %s2058_s2, 1024 }
  0x4b   :  { %p1588_p4 = scmp.ne.s32.totalorder %s2058_s2, %s1587_s11  ;;  %p1591_p5 = scmp.lt.u32.totalorder %s1587_s11, %s2058_s2 }
  0x4d   :  { %p1593_p6 = pnand %p1591_p5, %p1588_p4 }
  0x4f   :  { %1596 = shalt.err (!%p1593_p6)
}
  0x50   :  { %s1597_s0 = scalar_lea.vmem %s49_s25, 1024  ;;  %p1602_p8 = scmp.lt.s32.totalorder %s49_s25, %s49_s25 }
  0x51   :  { %p1598_p7 = scmp.ne.s32.totalorder %s49_s25, %s1597_s0  ;;  %p1603_p9 = scmp.lt.s32.totalorder %s1597_s0, %s1597_s0 }
  0x53   :  { %p1604_p10 = por %p1603_p9, %p1602_p8 }
  0x55   :  { %p1605_p11 = pnand %p1604_p10, %p1598_p7 }
  0x57   :  { %1608 = shalt.err (!%p1605_p11)
}
  0x58   :  { %54 = dma.hbm_to_vmem [thread:$0]  %s2058_s2, 1024, %s49_s25, [#allocation6], %s1735_s1, %s1735_s1, %s1736_s14  }
  0x59   :  { %s1609_s22 = scalar_lea.hbm %s2060_s4, 8192 }
  0x5a   :  { %p1610_p12 = scmp.ne.s32.totalorder %s2060_s4, %s1609_s22  ;;  %p1613_p13 = scmp.lt.u32.totalorder %s1609_s22, %s2060_s4 }
  0x5c   :  { %p1615_p0 = pnand %p1613_p13, %p1610_p12 }
  0x5e   :  { %1618 = shalt.err (!%p1615_p0)
}
  0x5f   :  { %s1619_s27 = scalar_lea.vmem %s1860_s28, 8192  ;;  %p1624_p2 = scmp.lt.s32.totalorder %s1860_s28, %s1860_s28 }
  0x60   :  { %p1620_p1 = scmp.ne.s32.totalorder %s1860_s28, %s1619_s27  ;;  %p1625_p3 = scmp.lt.s32.totalorder %s1619_s27, %s1619_s27 }
  0x62   :  { %p1626_p4 = por %p1625_p3, %p1624_p2 }
  0x64   :  { %p1627_p5 = pnand %p1626_p4, %p1620_p1 }
  0x66   :  { %1630 = shalt.err (!%p1627_p5)
}
  0x67   :  { %78 = dma.hbm_to_vmem [thread:$0]  %s2060_s4, 8192, %s1860_s28, [#allocation9], %s1739_s26, %s1739_s26, %s1740_s30  }
  0x68   :  { %s1743_s29 = smov [#allocation13]   ;;  %s1744_s11 = smov [#allocation14]  }
  0x69   :  { %s96_s3 = sshll.u32 %s1743_s29, 4  ;;  %s108_s12 = sshll.u32 %s1744_s11, 4  ;;  %s97_s3 = int_to_ptr.vmem [resolvable:$true] %s96_s3  ;;  %s1897_s12 = int_to_ptr.vmem [resolvable:$true] %s108_s12 }
  0x6a   :  { %s1631_s16 = scalar_lea.hbm %s2062_s6, 2048 }
  0x6b   :  { %p1632_p6 = scmp.ne.s32.totalorder %s2062_s6, %s1631_s16  ;;  %p1635_p7 = scmp.lt.u32.totalorder %s1631_s16, %s2062_s6 }
  0x6d   :  { %p1637_p8 = pnand %p1635_p7, %p1632_p6 }
  0x6f   :  { %1640 = shalt.err (!%p1637_p8)
}
  0x70   :  { %s1641_s4 = scalar_lea.vmem %s97_s3, 2048  ;;  %p1646_p10 = scmp.lt.s32.totalorder %s97_s3, %s97_s3 }
  0x71   :  { %p1642_p9 = scmp.ne.s32.totalorder %s97_s3, %s1641_s4  ;;  %p1647_p11 = scmp.lt.s32.totalorder %s1641_s4, %s1641_s4 }
  0x73   :  { %p1648_p12 = por %p1647_p11, %p1646_p10 }
  0x75   :  { %p1649_p13 = pnand %p1648_p12, %p1642_p9 }
  0x77   :  { %1652 = shalt.err (!%p1649_p13)
}
  0x78   :  { %102 = dma.hbm_to_vmem [thread:$0]  %s2062_s6, 2048, %s97_s3, [#allocation12], %s1739_s26, %s1739_s26, %s1740_s30  }
  0x79   :  { %s1653_s5 = scalar_lea.hbm %s2063_s7, 2048 }
  0x7a   :  { %p1654_p0 = scmp.ne.s32.totalorder %s2063_s7, %s1653_s5  ;;  %p1657_p1 = scmp.lt.u32.totalorder %s1653_s5, %s2063_s7 }
  0x7c   :  { %p1659_p2 = pnand %p1657_p1, %p1654_p0 }
  0x7e   :  { %1662 = shalt.err (!%p1659_p2)
}
  0x7f   :  { %s1663_s25 = scalar_lea.vmem %s1897_s12, 2048  ;;  %p1668_p4 = scmp.lt.s32.totalorder %s1897_s12, %s1897_s12 }
  0x80   :  { %p1664_p3 = scmp.ne.s32.totalorder %s1897_s12, %s1663_s25  ;;  %p1669_p5 = scmp.lt.s32.totalorder %s1663_s25, %s1663_s25 }
  0x82   :  { %p1670_p6 = por %p1669_p5, %p1668_p4 }
  0x84   :  { %p1671_p7 = pnand %p1670_p6, %p1664_p3 }
  0x86   :  { %1674 = shalt.err (!%p1671_p7)
}
  0x87   :  { %114 = dma.hbm_to_vmem [thread:$0]  %s2063_s7, 2048, %s1897_s12, [#allocation15], %s1735_s1, %s1735_s1, %s1736_s14  }
  0x88   :  { %1719 = dma.done.wait [#allocation3], 128  }
  0x89   :  { %1720 = vsyncadd [#allocation3], 4294967168 }
  0x8a   :  { %1721 = dma.done.wait [#allocation6], 1152  }
  0x8b   :  { %1722 = vsyncadd [#allocation6], 4294966144 }
  0x8c   :  { %1723 = dma.done.wait [#allocation9], 9216  }
  0x8d   :  { %1724 = vsyncadd [#allocation9], 4294958080 }
  0x8e   :  { %1725 = dma.done.wait [#allocation12], 3072  }
  0x8f   :  { %1726 = vsyncadd [#allocation12], 4294964224 }
  0x90   :  { %1727 = dma.done.wait [#allocation15], 2048  }
  0x91   :  { %1728 = vsyncadd [#allocation15], 4294965248  ;;  %v1745_v0 = vmov 0.0   ;;  %v172_v1 = vld [vmem:[#allocation10 + $0x18] sm:$0xff]  ;;  %v171_v3 = vld [vmem:[#allocation10 + $0x10] sm:$0xff]  ;;  %v376_v52 = vlaneseq  ;;  %vm739_vm0 = vcmask 130048  }
  0x92   :  { %368 = vmatprep.mubr.f32.mxu1 %v1745_v0  ;;  %297 = vmatprep.mubr.f32.mxu0 %v1745_v0  ;;  %v176_v2 = vld [vmem:[#allocation10 + $0x38] sm:$0xff]  ;;  %v175_v5 = vld [vmem:[#allocation10 + $0x30] sm:$0xff]  ;;  %v1746_v50 = vmov 1966171168   ;;  %vm674_vm1 = vcmask 261120   ;;  %vm909_vm2 = vcmask 1041409  }
  0x93   :  { %v1332_v4 = vpack.c.bf16 %v176_v2, %v172_v1  ;;  %v180_v6 = vld [vmem:[#allocation10 + $0x58] sm:$0xff]  ;;  %v1334_v8 = vpack.c.bf16 %v175_v5, %v171_v3  ;;  %v179_v10 = vld [vmem:[#allocation10 + $0x50] sm:$0xff]  ;;  %v397_v51 = vunpack.c.l.s4 %v1746_v50  ;;  %v1940_v54 = vshrl.u32 %v376_v52, 7  ;;  %v157_v1 = vld [vmem:[#allocation8] sm:$0xff]  ;;  %s1749_s11 = smov [#allocation17]  }
  0x94   :  { %v184_v7 = vld [vmem:[#allocation10 + $0x78] sm:$0xff]  ;;  %v183_v11 = vld [vmem:[#allocation10 + $0x70] sm:$0xff]  ;;  %v174_v52 = vld [vmem:[#allocation10 + $0x28] sm:$0xff]  ;;  %vm911_vm3 = vcmask 1042434   ;;  %vm913_vm4 = vcmask 1043459   ;;  %vm915_vm5 = vcmask 1044484  }
  0x95   :  { %v1336_v9 = vpack.c.bf16 %v184_v7, %v180_v6  ;;  %v188_v12 = vld [vmem:[#allocation10 + $0x98] sm:$0xff]  ;;  %1333 = vmatprep.subr.bf16.mxu1 %v1332_v4  ;;  %v1338_v14 = vpack.c.bf16 %v183_v11, %v179_v10  ;;  %v187_v16 = vld [vmem:[#allocation10 + $0x90] sm:$0xff]  ;;  %v398_v53 = vunpack.c.0.s8 %v397_v51  ;;  %v1946_v60 = vsub.s32 0, %v1940_v54  ;;  %v158_v7 = vld [vmem:[#allocation8 + $0x8] sm:$0xff]  ;;  %s1223_s12 = sshll.u32 %s1749_s11, 4  ;;  %s1224_s12 = int_to_ptr.vmem [resolvable:$true] %s1223_s12 }
  0x96   :  { %v192_v13 = vld [vmem:[#allocation10 + $0xb8] sm:$0xff]  ;;  %1335 = vmatpush1.bf16.msra.mxu1 %v1334_v8  ;;  %v191_v17 = vld [vmem:[#allocation10 + $0xb0] sm:$0xff]  ;;  %v170_v51 = vld [vmem:[#allocation10 + $0x8] sm:$0xff]  ;;  %vm917_vm6 = vcmask 1045509   ;;  %vm919_vm7 = vcmask 1046534   ;;  %vm921_vm8 = vcmask 1047559   ;;  %p1680_p9 = scmp.lt.s32.totalorder %s1224_s12, %s1224_s12 }
  0x97   :  { %1337 = vmatprep.subr.bf16.mxu1 %v1336_v9  ;;  %v1340_v15 = vpack.c.bf16 %v192_v13, %v188_v12  ;;  %v196_v18 = vld [vmem:[#allocation10 + $0xd8] sm:$0xff]  ;;  %v1342_v20 = vpack.c.bf16 %v191_v17, %v187_v16  ;;  %v195_v22 = vld [vmem:[#allocation10 + $0xd0] sm:$0xff]  ;;  %v401_v55 = vsub.s32 %v398_v53, %v1940_v54  ;;  %v161_v17 = vld [vmem:[#allocation8 + $0x20] sm:$0xff]  ;;  %v1300_v53 = vpack.c.bf16 %v174_v52, %v170_v51  ;;  %s1675_s13 = scalar_lea.vmem %s1224_s12, 128 }
  0x98   :  { %v200_v19 = vld [vmem:[#allocation10 + $0xf8] sm:$0xff]  ;;  %v199_v23 = vld [vmem:[#allocation10 + $0xf0] sm:$0xff]  ;;  %v217_v51 = vld [vmem:[#allocation10 + $0x180] sm:$0xff]  ;;  %vm1748_vm9 = vmmov 0   ;;  %p1676_p8 = scmp.ne.s32.totalorder %s1224_s12, %s1675_s13  ;;  %p1681_p10 = scmp.lt.s32.totalorder %s1675_s13, %s1675_s13 }
  0x99   :  { %v1344_v21 = vpack.c.bf16 %v200_v19, %v196_v18  ;;  %v204_v24 = vld [vmem:[#allocation10 + $0x118] sm:$0xff]  ;;  %v1346_v26 = vpack.c.bf16 %v199_v23, %v195_v22  ;;  %v203_v28 = vld [vmem:[#allocation10 + $0x110] sm:$0xff]  ;;  %1301 = vmatprep.subr.bf16.mxu0 %v1300_v53  ;;  %v893_v53 = vld [vmem:[#allocation13 + $0x40] sm:$0xff] }
  0x9a   :  { %1339 = vmatpush1.bf16.msra.mxu1 %v1338_v14  ;;  %v208_v25 = vld [vmem:[#allocation10 + $0x138] sm:$0xff]  ;;  %v207_v29 = vld [vmem:[#allocation10 + $0x130] sm:$0xff]  ;;  %p1682_p11 = por %p1681_p10, %p1680_p9 }
  0x9b   :  { %1341 = vmatprep.subr.bf16.mxu1 %v1340_v15  ;;  %v1348_v27 = vpack.c.bf16 %v208_v25, %v204_v24  ;;  %v212_v30 = vld [vmem:[#allocation10 + $0x158] sm:$0xff]  ;;  %v1350_v32 = vpack.c.bf16 %v207_v29, %v203_v28  ;;  %v211_v34 = vld [vmem:[#allocation10 + $0x150] sm:$0xff]  ;;  %v162_v24 = vld [vmem:[#allocation8 + $0x28] sm:$0xff] }
  0x9c   :  { %v216_v31 = vld [vmem:[#allocation10 + $0x178] sm:$0xff]  ;;  %v215_v35 = vld [vmem:[#allocation10 + $0x170] sm:$0xff]  ;;  %p1683_p12 = pnand %p1682_p11, %p1676_p8 }
  0x9d   :  { %v1352_v33 = vpack.c.bf16 %v216_v31, %v212_v30  ;;  %v220_v36 = vld [vmem:[#allocation10 + $0x198] sm:$0xff]  ;;  %v1354_v38 = vpack.c.bf16 %v215_v35, %v211_v34  ;;  %v219_v40 = vld [vmem:[#allocation10 + $0x190] sm:$0xff] }
  0x9e   :  { %1343 = vmatpush1.bf16.msra.mxu1 %v1342_v20  ;;  %v224_v37 = vld [vmem:[#allocation10 + $0x1b8] sm:$0xff]  ;;  %v223_v41 = vld [vmem:[#allocation10 + $0x1b0] sm:$0xff] }
  0x9f   :  { %1345 = vmatprep.subr.bf16.mxu1 %v1344_v21  ;;  %v1356_v39 = vpack.c.bf16 %v224_v37, %v220_v36  ;;  %v228_v42 = vld [vmem:[#allocation10 + $0x1d8] sm:$0xff]  ;;  %v1358_v44 = vpack.c.bf16 %v223_v41, %v219_v40  ;;  %v227_v46 = vld [vmem:[#allocation10 + $0x1d0] sm:$0xff] }
  0xa0   :  { %v232_v43 = vld [vmem:[#allocation10 + $0x1f8] sm:$0xff]  ;;  %v231_v47 = vld [vmem:[#allocation10 + $0x1f0] sm:$0xff] }
  0xa1   :  { %v1360_v45 = vpack.c.bf16 %v232_v43, %v228_v42  ;;  %v1362_v48 = vpack.c.bf16 %v231_v47, %v227_v46  ;;  %v1936_v49 = vld [vmem:[#allocation5] sm:$0xff]  ;;  %v159_v8 = vld [vmem:[#allocation8 + $0x10] sm:$0xff] }
  0xa2   :  { %1347 = vmatpush1.bf16.msra.mxu1 %v1346_v26  ;;  %v160_v12 = vld [vmem:[#allocation8 + $0x18] sm:$0xff] }
  0xa3   :  { %1349 = vmatprep.subr.bf16.mxu1 %v1348_v27  ;;  %v163_v27 = vld [vmem:[#allocation8 + $0x30] sm:$0xff]  ;;  %v164_v31 = vld [vmem:[#allocation8 + $0x38] sm:$0xff] }
  0xa6   :  { %1351 = vmatpush1.bf16.msra.mxu1 %v1350_v32  ;;  %v1240_v32 = vld [vmem:[%s2064_s8 + $0x7] ss:$0 sm:$0xff] }
  0xa7   :  { %1353 = vmatprep.subr.bf16.mxu1 %v1352_v33 }
  0xaa   :  { %1355 = vmatpush1.bf16.msra.mxu1 %v1354_v38 }
  0xab   :  { %1357 = vmatprep.subr.bf16.mxu1 %v1356_v39 }
  0xae   :  { %1359 = vmatpush1.bf16.msra.mxu1 %v1358_v44 }
  0xaf   :  { %1361 = vmatprep.subr.bf16.mxu1 %v1360_v45 }
  0xb2   :  { %1363 = vmatpush1.bf16.msra.mxu1 %v1362_v48 }
  0xb5   :  { %369 = vmatmul.mubr.f32.vlgmr.msra.gmra.mrb[0].mxu1 %v1936_v49 }
  0xb6   :  { %807 = vmatprep.mubr.f32.mxu1 %v1745_v0 }
 0x188   :  { %v1943_v56 = vpop.f32.mrb[0].mxu1 }
 0x189   :  { %v372_v57 = vpop.f32.mrb[1].mxu1 }
 0x18a   :  { %v395_v58 = vcombine.high %v372_v57, %v372_v57  ;;  %v402_v59 = vrot.slane %v372_v57, %v401_v55  ;;  %v173_v57 = vld [vmem:[#allocation10 + $0x20] sm:$0xff] }
 0x18c   :  { %v409_v61 = vrot.slane %v395_v58, %v401_v55  ;;  %v410_v62 = vcombine.high %v402_v59, %v402_v59  ;;  %v418_v63 = vrot.slane %v402_v59, %v401_v55  ;;  %v178_v59 = vld [vmem:[#allocation10 + $0x48] sm:$0xff] }
 0x18e   :  { %v411_v2 = vcombine.high %v409_v61, %v409_v61  ;;  %v425_v3 = vrot.slane %v409_v61, %v401_v55  ;;  %v432_v4 = vrot.slane %v410_v62, %v401_v55  ;;  %v440_v5 = vcombine.high %v418_v63, %v418_v63  ;;  %v182_v61 = vld [vmem:[#allocation10 + $0x68] sm:$0xff] }
 0x18f   :  { %v447_v6 = vrot.slane %v418_v63, %v1946_v60  ;;  %v1304_v62 = vpack.c.bf16 %v182_v61, %v178_v59  ;;  %v177_v63 = vld [vmem:[#allocation10 + $0x40] sm:$0xff]  ;;  %v888_v59 = vld [vmem:[#allocation13 + $0x18] sm:$0xff] }
 0x190   :  { %v439_v9 = vrot.slane %v411_v2, %v401_v55  ;;  %v442_v10 = vcombine.high %v432_v4, %v432_v4  ;;  %v451_v11 = vrot.slane %v432_v4, %v1946_v60  ;;  %v441_v13 = vcombine.high %v425_v3, %v425_v3  ;;  %v169_v55 = vld [vmem:[#allocation10] sm:$0xff]  ;;  %v190_v4 = vld [vmem:[#allocation10 + $0xa8] sm:$0xff]  ;;  %v892_v61 = vld [vmem:[#allocation13 + $0x38] sm:$0xff] }
 0x191   :  { %v455_v14 = vrot.slane %v440_v5, %v1946_v60  ;;  %v463_v15 = vrot.slane %v425_v3, %v1946_v60  ;;  %v484_v16 = vadd.f32 %v447_v6, %v157_v1  ;;  %v1302_v58 = vpack.c.bf16 %v173_v57, %v169_v55  ;;  %v181_v1 = vld [vmem:[#allocation10 + $0x60] sm:$0xff]  ;;  %v186_v3 = vld [vmem:[#allocation10 + $0x88] sm:$0xff] }
 0x192   :  { %v459_v18 = vrot.slane %v442_v10, %v1946_v60  ;;  %v485_v19 = vadd.f32 %v451_v11, %v158_v7  ;;  %v443_v21 = vcombine.high %v439_v9, %v439_v9  ;;  %v467_v22 = vrot.slane %v439_v9, %v1946_v60  ;;  %v185_v5 = vld [vmem:[#allocation10 + $0x80] sm:$0xff]  ;;  %v198_v9 = vld [vmem:[#allocation10 + $0xe8] sm:$0xff] }
 0x193   :  { %v486_v20 = vadd.f32 %v455_v14, %v159_v8  ;;  %1440 = vtanh.f32 %v484_v16  ;;  %v471_v25 = vrot.slane %v441_v13, %v1946_v60  ;;  %v488_v26 = vadd.f32 %v463_v15, %v161_v17  ;;  %1303 = vmatpush1.bf16.msra.mxu0 %v1302_v58  ;;  %v189_v7 = vld [vmem:[#allocation10 + $0xa0] sm:$0xff]  ;;  %v194_v8 = vld [vmem:[#allocation10 + $0xc8] sm:$0xff] }
 0x194   :  { %v487_v23 = vadd.f32 %v459_v18, %v160_v12  ;;  %1442 = vtanh.f32 %v485_v19  ;;  %v475_v28 = vrot.slane %v443_v21, %v1946_v60  ;;  %v489_v29 = vadd.f32 %v467_v22, %v162_v24  ;;  %1305 = vmatprep.subr.bf16.mxu0 %v1304_v62  ;;  %v193_v12 = vld [vmem:[#allocation10 + $0xc0] sm:$0xff]  ;;  %v202_v14 = vld [vmem:[#allocation10 + $0x108] sm:$0xff] }
 0x195   :  { %1444 = vtanh.f32 %v486_v20  ;;  %v490_v30 = vadd.f32 %v471_v25, %v163_v27  ;;  %v1306_v2 = vpack.c.bf16 %v181_v1, %v177_v63  ;;  %v1308_v6 = vpack.c.bf16 %v190_v4, %v186_v3  ;;  %v197_v13 = vld [vmem:[#allocation10 + $0xe0] sm:$0xff]  ;;  %v206_v15 = vld [vmem:[#allocation10 + $0x128] sm:$0xff]  ;;  %v734_v27 = vld [vmem:[#allocation11 + $0x18] sm:$0xff] }
 0x196   :  { %1446 = vtanh.f32 %v487_v23  ;;  %v491_v33 = vadd.f32 %v475_v28, %v164_v31  ;;  %v1310_v10 = vpack.c.bf16 %v189_v7, %v185_v5  ;;  %v1312_v11 = vpack.c.bf16 %v198_v9, %v194_v8  ;;  %v732_v16 = vld [vmem:[#allocation11 + $0x8] sm:$0xff]  ;;  %v731_v18 = vld [vmem:[#allocation11] sm:$0xff] }
 0x197   :  { %1448 = vtanh.f32 %v488_v26  ;;  %1307 = vmatpush1.bf16.msra.mxu0 %v1306_v2  ;;  %v736_v17 = vld [vmem:[#allocation11 + $0x28] sm:$0xff]  ;;  %v1314_v19 = vpack.c.bf16 %v197_v13, %v193_v12  ;;  %v201_v20 = vld [vmem:[#allocation10 + $0x100] sm:$0xff]  ;;  %v1316_v23 = vpack.c.bf16 %v206_v15, %v202_v14  ;;  %v1380_v3 = vpack.c.bf16 %v892_v61, %v888_v59 }
 0x198   :  { %1450 = vtanh.f32 %v489_v29  ;;  %1309 = vmatprep.subr.bf16.mxu0 %v1308_v6  ;;  %v1364_v21 = vpack.c.bf16 %v736_v17, %v732_v16  ;;  %v735_v22 = vld [vmem:[#allocation11 + $0x20] sm:$0xff]  ;;  %v210_v26 = vld [vmem:[#allocation10 + $0x148] sm:$0xff]  ;;  %v738_v29 = vld [vmem:[#allocation11 + $0x38] sm:$0xff] }
 0x199   :  { %1452 = vtanh.f32 %v490_v30  ;;  %v205_v24 = vld [vmem:[#allocation10 + $0x120] sm:$0xff]  ;;  %v1366_v25 = vpack.c.bf16 %v735_v22, %v731_v18  ;;  %v214_v28 = vld [vmem:[#allocation10 + $0x168] sm:$0xff]  ;;  %v733_v30 = vld [vmem:[#allocation11 + $0x10] sm:$0xff]  ;;  %v1368_v31 = vpack.c.bf16 %v738_v29, %v734_v27 }
 0x19a   :  { %1454 = vtanh.f32 %v491_v33  ;;  %1365 = vmatprep.subr.bf16.mxu1 %v1364_v21  ;;  %v737_v33 = vld [vmem:[#allocation11 + $0x30] sm:$0xff]  ;;  %v897_v55 = vld [vmem:[#allocation13 + $0x60] sm:$0xff]  ;;  %v226_v62 = vld [vmem:[#allocation10 + $0x1c8] sm:$0xff] }
 0x19b   :  { %1311 = vmatpush1.bf16.msra.mxu0 %v1310_v10  ;;  %1367 = vmatpush1.bf16.msra.mxu1 %v1366_v25  ;;  %v221_v58 = vld [vmem:[#allocation10 + $0x1a0] sm:$0xff]  ;;  %v230_v63 = vld [vmem:[#allocation10 + $0x1e8] sm:$0xff]  ;;  %v1378_v1 = vpack.c.bf16 %v897_v55, %v893_v53 }
 0x19c   :  { %1313 = vmatprep.subr.bf16.mxu0 %v1312_v11  ;;  %1369 = vmatprep.subr.bf16.mxu1 %v1368_v31  ;;  %v1326_v2 = vpack.c.bf16 %v221_v58, %v217_v51  ;;  %v1328_v4 = vpack.c.bf16 %v230_v63, %v226_v62  ;;  %v225_v5 = vld [vmem:[#allocation10 + $0x1c0] sm:$0xff] }
 0x19d   :  { %v1441_v34 = vpop.eup %1440  ;;  %v229_v6 = vld [vmem:[#allocation10 + $0x1e0] sm:$0xff] }
 0x19e   :  { %v506_v35 = vmul.f32 %v1441_v34, %v1240_v32  ;;  %v1443_v36 = vpop.eup %1442  ;;  %v1318_v34 = vpack.c.bf16 %v205_v24, %v201_v20  ;;  %v1330_v7 = vpack.c.bf16 %v229_v6, %v225_v5 }
 0x19f   :  { %v1445_v37 = vpop.eup %1444  ;;  %v507_v40 = vmul.f32 %v1443_v36, %v1240_v32  ;;  %1315 = vmatpush1.bf16.msra.mxu0 %v1314_v19  ;;  %v213_v36 = vld [vmem:[#allocation10 + $0x160] sm:$0xff] }
 0x1a0   :  { %514 = vadd.xlane.f32.xlu0 %v506_v35  ;;  %v508_v38 = vmul.f32 %v1445_v37, %v1240_v32  ;;  %v1447_v39 = vpop.eup %1446  ;;  %v209_v35 = vld [vmem:[#allocation10 + $0x140] sm:$0xff]  ;;  %v1370_v37 = vpack.c.bf16 %v737_v33, %v733_v30  ;;  %1317 = vmatprep.subr.bf16.mxu0 %v1316_v23 }
 0x1a1   :  { %v1449_v41 = vpop.eup %1448  ;;  %v509_v42 = vmul.f32 %v1447_v39, %v1240_v32  ;;  %v1320_v39 = vpack.c.bf16 %v214_v28, %v210_v26 }
 0x1a2   :  { %518 = vadd.xlane.f32.xlu1 %v508_v38  ;;  %v1451_v43 = vpop.eup %1450  ;;  %v510_v44 = vmul.f32 %v1449_v41, %v1240_v32  ;;  %v886_v38 = vld [vmem:[#allocation13 + $0x8] sm:$0xff]  ;;  %v885_v41 = vld [vmem:[#allocation13] sm:$0xff] }
 0x1a3   :  { %v1453_v45 = vpop.eup %1452  ;;  %v511_v46 = vmul.f32 %v1451_v43, %v1240_v32  ;;  %v218_v43 = vld [vmem:[#allocation10 + $0x188] sm:$0xff]  ;;  %1319 = vmatpush1.bf16.msra.mxu0 %v1318_v34 }
 0x1a4   :  { %516 = vadd.xlane.f32.xlu0 %v507_v40  ;;  %v1455_v47 = vpop.eup %1454  ;;  %v512_v48 = vmul.f32 %v1453_v45, %v1240_v32  ;;  %v890_v40 = vld [vmem:[#allocation13 + $0x28] sm:$0xff]  ;;  %1321 = vmatprep.subr.bf16.mxu0 %v1320_v39 }
 0x1a5   :  { %v513_v50 = vmul.f32 %v1455_v47, %v1240_v32  ;;  %v148_v32 = vld [vmem:[#allocation2] sm:$0xff]  ;;  %v1372_v45 = vpack.c.bf16 %v890_v40, %v886_v38  ;;  %v894_v47 = vld [vmem:[#allocation13 + $0x48] sm:$0xff] }
 0x1a6   :  { %520 = vadd.xlane.f32.xlu1 %v509_v42  ;;  %v889_v42 = vld [vmem:[#allocation13 + $0x20] sm:$0xff]  ;;  %1241 = vmatmul.mubr.msk.f32.vlgmr.msra.gmra.mrb[2].mxu1 %vm739_vm0, %v148_v32 }
 0x1a7   :  { %1371 = vmatpush1.bf16.msra.mxu1 %v1370_v37  ;;  %878 = vmatprep.mubr.f32.mxu1 %v1745_v0 }
 0x1a8   :  { %522 = vadd.xlane.f32.xlu0 %v510_v44  ;;  %v222_v44 = vld [vmem:[#allocation10 + $0x1a8] sm:$0xff]  ;;  %1373 = vmatprep.subr.bf16.mxu1 %v1372_v45 }
 0x1a9   :  { %v1324_v57 = vpack.c.bf16 %v222_v44, %v218_v43 }
 0x1aa   :  { %524 = vadd.xlane.f32.xlu1 %v511_v46  ;;  %v1374_v46 = vpack.c.bf16 %v889_v42, %v885_v41  ;;  %1242 = vmatmul.mubr.msk.f32.vlgmr.msra.gmra.mrb[4].mxu1 %vm739_vm0, %v148_v32 }
 0x1ab   :  { %989 = vmatprep.mubr.f32.mxu1 %v1745_v0 }
 0x1ac   :  { %526 = vadd.xlane.f32.xlu0 %v512_v48  ;;  %v898_v48 = vld [vmem:[#allocation13 + $0x68] sm:$0xff]  ;;  %1375 = vmatpush1.bf16.msra.mxu1 %v1374_v46 }
 0x1ad   :  { %v1376_v52 = vpack.c.bf16 %v898_v48, %v894_v47 }
 0x1ae   :  { %528 = vadd.xlane.f32.xlu1 %v513_v50  ;;  %v1322_v50 = vpack.c.bf16 %v213_v36, %v209_v35 }
 0x1af   :  { %1377 = vmatprep.subr.bf16.mxu1 %v1376_v52 }
 0x1b0   :  { %1323 = vmatpush1.bf16.msra.mxu0 %v1322_v50  ;;  %1379 = vmatpush1.bf16.msra.mxu1 %v1378_v1 }
 0x1b1   :  { %1325 = vmatprep.subr.bf16.mxu0 %v1324_v57  ;;  %1381 = vmatprep.subr.bf16.mxu1 %v1380_v3 }
 0x1b4   :  { %1327 = vmatpush1.bf16.msra.mxu0 %v1326_v2 }
 0x1b5   :  { %1329 = vmatprep.subr.bf16.mxu0 %v1328_v4 }
 0x1b8   :  { %1331 = vmatpush1.bf16.msra.mxu0 %v1330_v7 }
 0x1bb   :  { %298 = vmatmul.mubr.f32.vlgmr.msra.gmra.mrb[0].mxu0 %v1936_v49 }
 0x1bc   :  { %1297 = vmatprep.mubr.msk.f32.mxu0 %vm1748_vm9, %v1745_v0 }
 0x22d   :  { %v515_v8 = vpop.xlane.xlu0 %514 }
 0x22e   :  { %v530_v9 = vrot.slane %v515_v8, 4 }
 0x22f   :  { %v519_v11 = vpop.xlane.xlu1 %518 }
 0x230   :  { %v531_v10 = vmax.f32 %v515_v8, %v530_v9  ;;  %v542_v12 = vrot.slane %v519_v11, 4 }
 0x231   :  { %v517_v13 = vpop.xlane.xlu0 %516 }
 0x232   :  { %v532_v14 = vrot.slane %v531_v10, 2  ;;  %v536_v15 = vrot.slane %v517_v13, 4  ;;  %v543_v16 = vmax.f32 %v519_v11, %v542_v12 }
 0x233   :  { %v521_v19 = vpop.xlane.xlu1 %520 }
 0x234   :  { %v533_v17 = vmax.f32 %v531_v10, %v532_v14  ;;  %v537_v18 = vmax.f32 %v517_v13, %v536_v15  ;;  %v544_v20 = vrot.slane %v543_v16, 2  ;;  %v548_v21 = vrot.slane %v521_v19, 4 }
 0x235   :  { %v523_v22 = vpop.xlane.xlu0 %522 }
 0x236   :  { %v534_v23 = vrot.slane %v533_v17, 1  ;;  %v538_v24 = vrot.slane %v537_v18, 2  ;;  %v554_v25 = vrot.slane %v523_v22, 4  ;;  %v545_v26 = vmax.f32 %v543_v16, %v544_v20 }
 0x237   :  { %v549_v49 = vmax.f32 %v521_v19, %v548_v21  ;;  %v525_v30 = vpop.xlane.xlu1 %524 }
 0x238   :  { %v535_v27 = vmax.f32 %v533_v17, %v534_v23  ;;  %v539_v28 = vmax.f32 %v537_v18, %v538_v24  ;;  %v555_v29 = vmax.f32 %v523_v22, %v554_v25  ;;  %v546_v31 = vrot.slane %v545_v26, 1 }
 0x239   :  { %v550_v32 = vrot.slane %v549_v49, 2  ;;  %v560_v33 = vrot.slane %v525_v30, 4  ;;  %v527_v34 = vpop.xlane.xlu0 %526 }
 0x23a   :  { %v578_v35 = vsub.f32 %v515_v8, %v535_v27  ;;  %v540_v36 = vrot.slane %v539_v28, 1  ;;  %v556_v37 = vrot.slane %v555_v29, 2  ;;  %v566_v38 = vrot.slane %v527_v34, 4 }
 0x23b   :  { %v547_v39 = vmax.f32 %v545_v26, %v546_v31  ;;  %v551_v40 = vmax.f32 %v549_v49, %v550_v32  ;;  %v561_v41 = vmax.f32 %v525_v30, %v560_v33  ;;  %v529_v46 = vpop.xlane.xlu1 %528 }
 0x23c   :  { %v586_v42 = vmul.f32 1.442695, %v578_v35  ;;  %v541_v43 = vmax.f32 %v539_v28, %v540_v36  ;;  %v557_v44 = vmax.f32 %v555_v29, %v556_v37  ;;  %v567_v45 = vmax.f32 %v527_v34, %v566_v38 }
 0x23d   :  { %v580_v47 = vsub.f32 %v519_v11, %v547_v39  ;;  %v552_v48 = vrot.slane %v551_v40, 1  ;;  %v562_v50 = vrot.slane %v561_v41, 2  ;;  %v572_v51 = vrot.slane %v529_v46, 4 }
 0x23e   :  { %1456 = vpow2.f32 %v586_v42  ;;  %v579_v52 = vsub.f32 %v517_v13, %v541_v43  ;;  %v558_v53 = vrot.slane %v557_v44, 1  ;;  %v568_v55 = vrot.slane %v567_v45, 2 }
 0x23f   :  { %v590_v57 = vmul.f32 1.442695, %v580_v47  ;;  %v553_v58 = vmax.f32 %v551_v40, %v552_v48  ;;  %v563_v59 = vmax.f32 %v561_v41, %v562_v50  ;;  %v573_v61 = vmax.f32 %v529_v46, %v572_v51 }
 0x240   :  { %v588_v62 = vmul.f32 1.442695, %v579_v52  ;;  %v559_v63 = vmax.f32 %v557_v44, %v558_v53  ;;  %v569_v1 = vmax.f32 %v567_v45, %v568_v55 }
 0x241   :  { %1458 = vpow2.f32 %v590_v57  ;;  %v581_v2 = vsub.f32 %v521_v19, %v553_v58  ;;  %v564_v3 = vrot.slane %v563_v59, 1  ;;  %v574_v4 = vrot.slane %v573_v61, 2 }
 0x242   :  { %1460 = vpow2.f32 %v588_v62  ;;  %v582_v5 = vsub.f32 %v523_v22, %v559_v63  ;;  %v570_v6 = vrot.slane %v569_v1, 1 }
 0x243   :  { %v592_v7 = vmul.f32 1.442695, %v581_v2  ;;  %v565_v8 = vmax.f32 %v563_v59, %v564_v3  ;;  %v575_v9 = vmax.f32 %v573_v61, %v574_v4 }
 0x244   :  { %v594_v10 = vmul.f32 1.442695, %v582_v5  ;;  %v571_v11 = vmax.f32 %v569_v1, %v570_v6 }
 0x245   :  { %1462 = vpow2.f32 %v592_v7  ;;  %v583_v12 = vsub.f32 %v525_v30, %v565_v8  ;;  %v576_v13 = vrot.slane %v575_v9, 1 }
 0x246   :  { %1464 = vpow2.f32 %v594_v10  ;;  %v584_v14 = vsub.f32 %v527_v34, %v571_v11 }
 0x247   :  { %v596_v15 = vmul.f32 1.442695, %v583_v12  ;;  %v577_v16 = vmax.f32 %v575_v9, %v576_v13 }
 0x248   :  { %v1964_v17 = vpop.eup %1456  ;;  %v598_v18 = vmul.f32 1.442695, %v584_v14 }
 0x249   :  { %v602_v19 = vrot.slane %v1964_v17, 4  ;;  %1466 = vpow2.f32 %v596_v15  ;;  %v585_v20 = vsub.f32 %v529_v46, %v577_v16  ;;  %v149_v15 = vld [vmem:[#allocation7] sm:$0xff] }
 0x24a   :  { %1468 = vpow2.f32 %v598_v18 }
 0x24b   :  { %v1967_v21 = vpop.eup %1458  ;;  %v603_v22 = vadd.f32 %v1964_v17, %v602_v19  ;;  %v600_v23 = vmul.f32 1.442695, %v585_v20  ;;  %v151_v20 = vld [vmem:[#allocation7 + $0x10] sm:$0xff] }
 0x24c   :  { %v1970_v24 = vpop.eup %1460  ;;  %v614_v25 = vrot.slane %v1967_v21, 4 }
 0x24d   :  { %v604_v26 = vrot.slane %v603_v22, 2  ;;  %v608_v49 = vrot.slane %v1970_v24, 4  ;;  %1470 = vpow2.f32 %v600_v23 }
 0x24e   :  { %v615_v27 = vadd.f32 %v1967_v21, %v614_v25 }
 0x24f   :  { %v1975_v28 = vpop.eup %1462  ;;  %v605_v29 = vadd.f32 %v604_v26, %v603_v22  ;;  %v609_v30 = vadd.f32 %v1970_v24, %v608_v49  ;;  %v150_v49 = vld [vmem:[#allocation7 + $0x8] sm:$0xff] }
 0x250   :  { %v1978_v31 = vpop.eup %1464  ;;  %v616_v32 = vrot.slane %v615_v27, 2  ;;  %v620_v33 = vrot.slane %v1975_v28, 4 }
 0x251   :  { %v606_v34 = vrot.slane %v605_v29, 1  ;;  %v610_v35 = vrot.slane %v609_v30, 2  ;;  %v626_v36 = vrot.slane %v1978_v31, 4 }
 0x252   :  { %v617_v37 = vadd.f32 %v616_v32, %v615_v27  ;;  %v621_v38 = vadd.f32 %v1975_v28, %v620_v33  ;;  %v152_v33 = vld [vmem:[#allocation7 + $0x18] sm:$0xff] }
 0x253   :  { %v1983_v39 = vpop.eup %1466  ;;  %v607_v40 = vadd.f32 %v606_v34, %v605_v29  ;;  %v611_v41 = vadd.f32 %v610_v35, %v609_v30  ;;  %v627_v42 = vadd.f32 %v1978_v31, %v626_v36  ;;  %v153_v36 = vld [vmem:[#allocation7 + $0x20] sm:$0xff] }
 0x254   :  { %v1986_v43 = vpop.eup %1468  ;;  %v618_v44 = vrot.slane %v617_v37, 1  ;;  %v622_v45 = vrot.slane %v621_v38, 2  ;;  %v632_v46 = vrot.slane %v1983_v39, 4 }
 0x255   :  { %1472 = vrcp.f32 %v607_v40  ;;  %v612_v47 = vrot.slane %v611_v41, 1  ;;  %v628_v48 = vrot.slane %v627_v42, 2  ;;  %v638_v50 = vrot.slane %v1986_v43, 4 }
 0x256   :  { %v619_v51 = vadd.f32 %v618_v44, %v617_v37  ;;  %v623_v52 = vadd.f32 %v622_v45, %v621_v38  ;;  %v633_v53 = vadd.f32 %v1983_v39, %v632_v46 }
 0x257   :  { %v1991_v55 = vpop.eup %1470  ;;  %v613_v57 = vadd.f32 %v612_v47, %v611_v41  ;;  %v629_v58 = vadd.f32 %v628_v48, %v627_v42  ;;  %v639_v59 = vadd.f32 %v1986_v43, %v638_v50  ;;  %v154_v47 = vld [vmem:[#allocation7 + $0x28] sm:$0xff] }
 0x258   :  { %1474 = vrcp.f32 %v619_v51  ;;  %v624_v61 = vrot.slane %v623_v52, 1  ;;  %v634_v62 = vrot.slane %v633_v53, 2  ;;  %v644_v63 = vrot.slane %v1991_v55, 4 }
 0x259   :  { %1476 = vrcp.f32 %v613_v57  ;;  %v630_v1 = vrot.slane %v629_v58, 1  ;;  %v640_v2 = vrot.slane %v639_v59, 2 }
 0x25a   :  { %v625_v3 = vadd.f32 %v624_v61, %v623_v52  ;;  %v635_v4 = vadd.f32 %v634_v62, %v633_v53  ;;  %v645_v5 = vadd.f32 %v1991_v55, %v644_v63  ;;  %v155_v52 = vld [vmem:[#allocation7 + $0x30] sm:$0xff] }
 0x25b   :  { %v631_v6 = vadd.f32 %v630_v1, %v629_v58  ;;  %v641_v7 = vadd.f32 %v640_v2, %v639_v59 }
 0x25c   :  { %1478 = vrcp.f32 %v625_v3  ;;  %v636_v8 = vrot.slane %v635_v4, 1  ;;  %v646_v9 = vrot.slane %v645_v5, 2 }
 0x25d   :  { %1480 = vrcp.f32 %v631_v6  ;;  %v642_v10 = vrot.slane %v641_v7, 1 }
 0x25e   :  { %v637_v11 = vadd.f32 %v636_v8, %v635_v4  ;;  %v647_v12 = vadd.f32 %v646_v9, %v645_v5  ;;  %v156_v4 = vld [vmem:[#allocation7 + $0x38] sm:$0xff] }
 0x25f   :  { %v1473_v13 = vpop.eup %1472  ;;  %v643_v14 = vadd.f32 %v642_v10, %v641_v7 }
 0x260   :  { %v651_v16 = vmul.f32 %v1473_v13, %v1964_v17  ;;  %1482 = vrcp.f32 %v637_v11  ;;  %v648_v18 = vrot.slane %v647_v12, 1 }
 0x261   :  { %1484 = vrcp.f32 %v643_v14 }
 0x262   :  { %v1475_v19 = vpop.eup %1474  ;;  %v649_v22 = vadd.f32 %v648_v18, %v647_v12  ;;  %v666_v23 = vmul.f32 %v651_v16, %v149_v15 }
 0x263   :  { %v1477_v25 = vpop.eup %1476  ;;  %v655_v26 = vmul.f32 %v1475_v19, %v1967_v21 }
 0x264   :  { %v653_v27 = vmul.f32 %v1477_v25, %v1970_v24  ;;  %1486 = vrcp.f32 %v649_v22  ;;  %v675_v29 = vsel %vm674_vm1, %v666_v23, 0.0 }
 0x265   :  { %v668_v30 = vmul.f32 %v655_v26, %v151_v20  ;;  %v676_v32 = vrot.slane %v675_v29, 4 }
 0x266   :  { %v1479_v17 = vpop.eup %1478  ;;  %v667_v34 = vmul.f32 %v653_v27, %v150_v49 }
 0x267   :  { %v1481_v35 = vpop.eup %1480  ;;  %v657_v37 = vmul.f32 %v1479_v17, %v1975_v28  ;;  %v677_v38 = vadd.f32 %v676_v32, %v675_v29  ;;  %v689_v40 = vsel %vm674_vm1, %v668_v30, 0.0 }
 0x268   :  { %v659_v21 = vmul.f32 %v1481_v35, %v1978_v31  ;;  %v682_v41 = vsel %vm674_vm1, %v667_v34, 0.0  ;;  %v690_v24 = vrot.slane %v689_v40, 4 }
 0x269   :  { %v669_v42 = vmul.f32 %v657_v37, %v152_v33  ;;  %v678_v44 = vrot.slane %v677_v38, 2  ;;  %v683_v45 = vrot.slane %v682_v41, 4 }
 0x26a   :  { %v1483_v46 = vpop.eup %1482  ;;  %v670_v48 = vmul.f32 %v659_v21, %v153_v36  ;;  %v691_v50 = vadd.f32 %v690_v24, %v689_v40 }
 0x26b   :  { %v1485_v51 = vpop.eup %1484  ;;  %v661_v53 = vmul.f32 %v1483_v46, %v1983_v39  ;;  %v679_v28 = vadd.f32 %v678_v44, %v677_v38  ;;  %v684_v57 = vadd.f32 %v683_v45, %v682_v41  ;;  %v696_v58 = vsel %vm674_vm1, %v669_v42, 0.0 }
 0x26c   :  { %v663_v31 = vmul.f32 %v1485_v51, %v1986_v43  ;;  %v692_v59 = vrot.slane %v691_v50, 2  ;;  %v697_v61 = vrot.slane %v696_v58, 4  ;;  %v703_v62 = vsel %vm674_vm1, %v670_v48, 0.0  ;;  %v887_v48 = vld [vmem:[#allocation13 + $0x10] sm:$0xff] }
 0x26d   :  { %v671_v63 = vmul.f32 %v661_v53, %v154_v47  ;;  %v685_v1 = vrot.slane %v684_v57, 2  ;;  %v704_v2 = vrot.slane %v703_v62, 4  ;;  %v680_v6 = vrot.slane %v679_v28, 1  ;;  %v896_v53 = vld [vmem:[#allocation13 + $0x58] sm:$0xff] }
 0x26e   :  { %v1487_v3 = vpop.eup %1486  ;;  %v672_v5 = vmul.f32 %v663_v31, %v155_v52  ;;  %v693_v7 = vadd.f32 %v692_v59, %v691_v50  ;;  %v698_v8 = vadd.f32 %v697_v61, %v696_v58  ;;  %v891_v50 = vld [vmem:[#allocation13 + $0x30] sm:$0xff] }
 0x26f   :  { %v665_v39 = vmul.f32 %v1487_v3, %v1991_v55  ;;  %v686_v9 = vadd.f32 %v685_v1, %v684_v57  ;;  %v705_v10 = vadd.f32 %v704_v2, %v703_v62  ;;  %v710_v12 = vsel %vm674_vm1, %v671_v63, 0.0  ;;  %v895_v62 = vld [vmem:[#allocation13 + $0x50] sm:$0xff] }
 0x270   :  { %v694_v11 = vrot.slane %v693_v7, 1  ;;  %v699_v43 = vrot.slane %v698_v8, 2  ;;  %v717_v13 = vsel %vm674_vm1, %v672_v5, 0.0  ;;  %v711_v18 = vrot.slane %v710_v12, 4  ;;  %v899_v63 = vld [vmem:[#allocation13 + $0x70] sm:$0xff]  ;;  %v1118_v5 = vld [vmem:[#allocation14] sm:$0xff] }
 0x271   :  { %v673_v14 = vmul.f32 %v665_v39, %v156_v4  ;;  %v687_v15 = vrot.slane %v686_v9, 1  ;;  %v706_v16 = vrot.slane %v705_v10, 2  ;;  %v681_v19 = vadd.f32 %v680_v6, %v679_v28  ;;  %v900_v28 = vld [vmem:[#allocation13 + $0x78] sm:$0xff]  ;;  %v1119_v6 = vld [vmem:[#allocation14 + $0x8] sm:$0xff]  ;;  %v1120_v39 = vld [vmem:[#allocation14 + $0x10] sm:$0xff] }
 0x272   :  { %v700_v20 = vadd.f32 %v699_v43, %v698_v8  ;;  %v718_v22 = vrot.slane %v717_v13, 4  ;;  %v712_v55 = vadd.f32 %v711_v18, %v710_v12  ;;  %v695_v49 = vadd.f32 %v694_v11, %v693_v7  ;;  %v1122_v11 = vld [vmem:[#allocation14 + $0x20] sm:$0xff]  ;;  %v1123_v43 = vld [vmem:[#allocation14 + $0x28] sm:$0xff] }
 0x273   :  { %v688_v23 = vadd.f32 %v687_v15, %v686_v9  ;;  %v707_v25 = vadd.f32 %v706_v16, %v705_v10  ;;  %v724_v26 = vsel %vm674_vm1, %v673_v14, 0.0  ;;  %v1382_v59 = vpack.c.bf16 %v891_v50, %v887_v48  ;;  %v1121_v9 = vld [vmem:[#allocation14 + $0x18] sm:$0xff]  ;;  %v1126_v16 = vld [vmem:[#allocation14 + $0x40] sm:$0xff]  ;;  %v1127_v18 = vld [vmem:[#allocation14 + $0x48] sm:$0xff] }
 0x274   :  { %v701_v27 = vrot.slane %v700_v20, 1  ;;  %v719_v29 = vadd.f32 %v718_v22, %v717_v13  ;;  %v725_v30 = vrot.slane %v724_v26, 4  ;;  %v713_v17 = vrot.slane %v712_v55, 2  ;;  %v1124_v13 = vld [vmem:[#allocation14 + $0x30] sm:$0xff]  ;;  %v1125_v14 = vld [vmem:[#allocation14 + $0x38] sm:$0xff] }
 0x275   :  { %v708_v32 = vrot.slane %v707_v25, 1  ;;  %v910_v33 = vsel %vm909_vm2, %v688_v23, %v681_v19  ;;  %v1384_v61 = vpack.c.bf16 %v900_v28, %v896_v53  ;;  %v1386_v2 = vpack.c.bf16 %v899_v63, %v895_v62  ;;  %v1129_v22 = vld [vmem:[#allocation14 + $0x58] sm:$0xff] }
 0x276   :  { %v702_v34 = vadd.f32 %v701_v27, %v700_v20  ;;  %v720_v35 = vrot.slane %v719_v29, 2  ;;  %v726_v36 = vadd.f32 %v725_v30, %v724_v26  ;;  %v912_v37 = vsel %vm911_vm3, %v695_v49, %v910_v33  ;;  %v1128_v20 = vld [vmem:[#allocation14 + $0x50] sm:$0xff]  ;;  %v1133_v27 = vld [vmem:[#allocation14 + $0x78] sm:$0xff] }
 0x277   :  { %v709_v38 = vadd.f32 %v708_v32, %v707_v25  ;;  %v714_v40 = vadd.f32 %v713_v17, %v712_v55  ;;  %v1389_v7 = vpack.c.bf16 %v1119_v6, %v1118_v5  ;;  %v1747_v8 = vmov 0.0|0.0   ;;  %v1130_v25 = vld [vmem:[#allocation14 + $0x60] sm:$0xff]  ;;  %v1131_v55 = vld [vmem:[#allocation14 + $0x68] sm:$0xff]  ;;  %v1132_v49 = vld [vmem:[#allocation14 + $0x70] sm:$0xff] }
 0x278   :  { %v721_v21 = vadd.f32 %v720_v35, %v719_v29  ;;  %v727_v41 = vrot.slane %v726_v36, 2  ;;  %v914_v24 = vsel %vm913_vm4, %v702_v34, %v912_v37  ;;  %1388 = vmatprep.subr.bf16.mxu0 %v1747_v8  ;;  %v1392_v10 = vpack.c.bf16 %v1121_v9, %v1120_v39  ;;  %v165_v33 = vld [vmem:[%s2064_s8] sm:$0x7] }
 0x279   :  { %v715_v42 = vrot.slane %v714_v40, 1  ;;  %v916_v46 = vsel %vm915_vm5, %v709_v38, %v914_v24  ;;  %1390 = vmatpush3.bf16.msra.mxu0 %v1389_v7  ;;  %v1395_v12 = vpack.c.bf16 %v1123_v43, %v1122_v11  ;;  %v1398_v15 = vpack.c.bf16 %v1125_v14, %v1124_v13 }
 0x27a   :  { %v722_v44 = vrot.slane %v721_v21, 1  ;;  %v728_v45 = vadd.f32 %v727_v41, %v726_v36  ;;  %1391 = vmatprep.subr.bf16.mxu0 %v1747_v8  ;;  %v1401_v19 = vpack.c.bf16 %v1127_v18, %v1126_v16  ;;  %v1404_v23 = vpack.c.bf16 %v1129_v22, %v1128_v20 }
 0x27b   :  { %v716_v47 = vadd.f32 %v715_v42, %v714_v40  ;;  %v1407_v26 = vpack.c.bf16 %v1131_v55, %v1130_v25  ;;  %v1410_v29 = vpack.c.bf16 %v1133_v27, %v1132_v49  ;;  %v382_v30 = vsub.s32 1, %v1940_v54 }
 0x27c   :  { %v723_v51 = vadd.f32 %v722_v44, %v721_v21  ;;  %v729_v52 = vrot.slane %v728_v45, 1  ;;  %v1074_v36 = vrot.slane %v165_v33, %v1946_v60 }
 0x27d   :  { %v918_v57 = vsel %vm917_vm6, %v716_v47, %v916_v46  ;;  %1393 = vmatpush3.bf16.msra.mxu0 %v1392_v10  ;;  %v1078_v21 = vrot.slane %v165_v33, %v382_v30 }
 0x27e   :  { %v730_v58 = vadd.f32 %v729_v52, %v728_v45  ;;  %v920_v31 = vsel %vm919_vm7, %v723_v51, %v918_v57  ;;  %1394 = vmatprep.subr.bf16.mxu0 %v1747_v8  ;;  %v386_v51 = vsub.s32 2, %v1940_v54 }
 0x280   :  { %v922_v1 = vsel %vm921_vm8, %v730_v58, %v920_v31  ;;  %v1082_v28 = vrot.slane %v165_v33, %v386_v51 }
 0x281   :  { %1243 = vmatmul.mubr.msk.f32.vlgmr.msra.gmra.mrb[2].mxu1 %vm674_vm1, %v922_v1  ;;  %1396 = vmatpush3.bf16.msra.mxu0 %v1395_v12 }
 0x282   :  { %1383 = vmatpush1.bf16.msra.mxu1 %v1382_v59  ;;  %1060 = vmatprep.mubr.f32.mxu1 %v1745_v0  ;;  %v166_v0 = vld [vmem:[%s2064_s8 + $0x3] sm:$0x7] }
 0x283   :  { %1385 = vmatprep.subr.bf16.mxu1 %v1384_v61  ;;  %1397 = vmatprep.subr.bf16.mxu0 %v1747_v8  ;;  %v379_v32 = vrot.slane %v166_v0, %v1946_v60  ;;  %v383_v17 = vrot.slane %v166_v0, %v382_v30  ;;  %v387_v60 = vrot.slane %v166_v0, %v386_v51 }
 0x285   :  { %1399 = vmatpush3.bf16.msra.mxu0 %v1398_v15  ;;  %v393_v57 = vadd.f32 %v387_v60, %v1943_v56 }
 0x286   :  { %1387 = vmatpush1.bf16.msra.mxu1 %v1386_v2  ;;  %1400 = vmatprep.subr.bf16.mxu0 %v1747_v8 }
 0x289   :  { %1244 = vmatmul.mubr.msk.f32.vlgmr.msra.gmra.mrb[4].mxu1 %vm674_vm1, %v922_v1  ;;  %1402 = vmatpush3.bf16.msra.mxu0 %v1401_v19 }
 0x28a   :  { %1403 = vmatprep.subr.bf16.mxu0 %v1747_v8 }
 0x28d   :  { %1405 = vmatpush3.bf16.msra.mxu0 %v1404_v23 }
 0x28e   :  { %v299_v3 = vpop.f32.mrb[0].mxu0  ;;  %1406 = vmatprep.subr.bf16.mxu0 %v1747_v8 }
 0x28f   :  { %v301_v4 = vpop.f32.mrb[1].mxu0  ;;  %v391_v34 = vadd.f32 %v379_v32, %v299_v3  ;;  %v1498_v3 = vld [vmem:[#allocation5] sm:$0xff] }
 0x290   :  { %v392_v35 = vadd.f32 %v383_v17, %v301_v4 }
 0x291   :  { %1408 = vmatpush3.bf16.msra.mxu0 %v1407_v26 }
 0x292   :  { %1409 = vmatprep.subr.bf16.mxu0 %v1747_v8 }
 0x295   :  { %1411 = vmatpush3.bf16.msra.mxu0 %v1410_v29 }
 0x354   :  { %v991_v37 = vpop.f32.mrb[2].mxu1 }
 0x355   :  { %v1413_v38 = vadd.f32 %v991_v37, %v391_v34  ;;  %v993_v40 = vpop.f32.mrb[3].mxu1 }
 0x356   :  { %v1416_v41 = vadd.f32 %v993_v40, %v392_v35 }
 0x357   :  { %v1414_v24 = vadd.f32 %v1413_v38, %v1074_v36 }
 0x358   :  { %v1417_v44 = vadd.f32 %v1416_v41, %v1078_v21 }
 0x359   :  { %v1245_v42 = vmul.f32 -1.442695, %v1414_v24 }
 0x35a   :  { %v1246_v47 = vmul.f32 -1.442695, %v1417_v44 }
 0x35b   :  { %1488 = vpow2.f32 %v1245_v42 }
 0x35c   :  { %v1062_v45 = vpop.f32.mrb[4].mxu1  ;;  %1490 = vpow2.f32 %v1246_v47 }
 0x35d   :  { %v1064_v46 = vpop.f32.mrb[5].mxu1  ;;  %v1088_v31 = vadd.f32 %v1082_v28, %v1062_v45 }
 0x365   :  { %v1489_v48 = vpop.eup %1488 }
 0x366   :  { %v1093_v50 = vadd.f32 1.0, %v1489_v48  ;;  %v1491_v52 = vpop.eup %1490 }
 0x367   :  { %v1100_v53 = vadd.f32 1.0, %v1491_v52 }
 0x368   :  { %1492 = vrcp.f32 %v1093_v50 }
 0x369   :  { %1494 = vrcp.f32 %v1100_v53 }
 0x372   :  { %v1493_v58 = vpop.eup %1492 }
 0x373   :  { %v1103_v59 = vmul.f32 %v1493_v58, %v393_v57  ;;  %v1495_v62 = vpop.eup %1494 }
 0x374   :  { %v1106_v63 = vsub.f32 1.0, %v1495_v62  ;;  %v1108_v4 = vmul.f32 %v1498_v3, %v1495_v62 }
 0x375   :  { %v1104_v61 = vadd.f32 %v1103_v59, %v1088_v31 }
 0x377   :  { %1496 = vtanh.f32 %v1104_v61 }
 0x381   :  { %v1497_v1 = vpop.eup %1496 }
 0x382   :  { %v1107_v2 = vmul.f32 %v1497_v1, %v1106_v63 }
 0x384   :  { %v1109_v5 = vadd.f32 %v1108_v4, %v1107_v2 }
 0x386   :  { %1298 = vmatmul.mubr.f32.vlgmr.msra.gmra.mrb[2].mxu0 %v1109_v5  ;;  %1206 = vst [vmem:[#allocation17] sm:$0xff] %v1109_v5 }
 0x387   :  { %1686 = shalt.err (!%p1683_p12)
}
 0x388   :  { %s1687_s0 = scalar_lea.hbm %s2066_s10, 128 }
 0x389   :  { %p1688_p13 = scmp.ne.s32.totalorder %s2066_s10, %s1687_s0  ;;  %p1691_p0 = scmp.lt.u32.totalorder %s1687_s0, %s2066_s10 }
 0x38b   :  { %p1693_p1 = pnand %p1691_p0, %p1688_p13 }
 0x38d   :  { %1696 = shalt.err (!%p1693_p1)
}
 0x38e   :  { %1226 = dma.vmem_to_hbm [thread:$0]  %s1224_s12, 128, %s2066_s10, [#allocation18]   ;;  %v1247_v54 = vld [vmem:[%s2064_s8 + $0x6] ss:$0 sm:$0xff] }
 0x38f   :  { %s1750_s5 = smov [#allocation16]   ;;  %v1117_v56 = vadd.f32 %v1247_v54, %v1064_v46 }
 0x390   :  { %s1213_s19 = sshll.u32 %s1750_s5, 4  ;;  %s1214_s19 = int_to_ptr.vmem [resolvable:$true] %s1213_s19 }
 0x391   :  { %s1697_s24 = scalar_lea.vmem %s1214_s19, 128  ;;  %p1702_p3 = scmp.lt.s32.totalorder %s1214_s19, %s1214_s19 }
 0x392   :  { %p1698_p2 = scmp.ne.s32.totalorder %s1214_s19, %s1697_s24  ;;  %p1703_p4 = scmp.lt.s32.totalorder %s1697_s24, %s1697_s24 }
 0x394   :  { %p1704_p5 = por %p1703_p4, %p1702_p3 }
 0x396   :  { %p1705_p6 = pnand %p1704_p5, %p1698_p2 }
 0x459   :  { %v1200_v6 = vpop.f32.mrb[2].mxu0 }
 0x45a   :  { %v1204_v7 = vadd.f32 %v1200_v6, %v1117_v56  ;;  %v1299_v8 = vpop.f32.mrb[3].mxu0 }
 0x45c   :  { %1205 = vst [vmem:[#allocation16] sm:$0xff] %v1204_v7 }
 0x45d   :  { %1708 = shalt.err (!%p1705_p6)
}
 0x45e   :  { %s1709_s2 = scalar_lea.hbm %s2065_s9, 128 }
 0x45f   :  { %p1710_p7 = scmp.ne.s32.totalorder %s2065_s9, %s1709_s2  ;;  %p1713_p8 = scmp.lt.u32.totalorder %s1709_s2, %s2065_s9 }
 0x461   :  { %p1715_p9 = pnand %p1713_p8, %p1710_p7 }
 0x463   :  { %1718 = shalt.err (!%p1715_p9)
}
 0x464   :  { %1216 = dma.vmem_to_hbm [thread:$0]  %s1214_s19, 128, %s2065_s9, [#allocation4]  }
 0x465   :  { %1729 = dma.done.wait [#allocation4], 128  }
 0x466   :  { %1730 = vsyncadd [#allocation4], 4294967168 }
 0x467   :  { %1731 = dma.done.wait [#allocation18], 128  }
 0x468   :  { %1732 = vsyncadd [#allocation18], 4294967168 }
 0x469   :  { %1233 = vsyncpa [#allocation3], 1 }
 0x46a   :  { %1234 = vsyncpa [#allocation6], 1 }
 0x46b   :  { %1235 = vsyncpa [#allocation9], 1 }
 0x46c   :  { %1236 = vsyncpa [#allocation12], 1 }
 0x46d   :  { %1237 = vsyncpa [#allocation15], 1 }
 0x46e   :  { %1238 = vsyncpa [#allocation4], 1 }
 0x46f   :  { %1239 = vsyncpa [#allocation18], 1 }

</bundles_post_ra>
